<compile_context>
chip_gen: v6e
topology: v6e:2x2x1
jax: 0.10.0
libtpu: 0.0.40
codegen_flags: <defaults>
</compile_context>

<pallas_src>
import jax
import jax.numpy as jnp
from jax.experimental import pallas as pl
from jax.experimental.pallas import tpu as pltpu


# ----------------------------- kernel helpers ------------------------------

def _gelu(x):
    # tanh-approx GELU (BERT-style), f32 math (tanh -> EUP slot)
    return 0.5 * x * (1.0 + jnp.tanh(0.7978845608028654 * (x + 0.044715 * x * x * x)))


def _layernorm(x, eps=1e-12):
    mu = jnp.mean(x, axis=-1, keepdims=True)
    var = jnp.mean((x - mu) * (x - mu), axis=-1, keepdims=True)
    return (x - mu) * jax.lax.rsqrt(var + eps)


def _bert_encoder(h, wqkv, wo, w1, w2):
    """h: (Bt, S, H) bf16 -> final hidden (Bt*S, H) f32 (attn + FFN blocks).

    Single-head attention + FFN.  All projections run on the flattened
    (Bt*S, H) slab; bf16 matmuls with f32 accumulation; LN/softmax/GELU in f32.
    """
    bt, s, hd = h.shape
    m = bt * s
    h_bf = h.reshape(m, hd)                      # (M, H) bf16 matmul operand
    hf = h_bf.astype(jnp.float32)                # f32 residual stream

    # --- fused QKV projection: one (M,H) x (H,3H) bf16 matmul ---
    qkv = jnp.dot(h_bf, wqkv, preferred_element_type=jnp.float32)   # (M, 3H)
    q = qkv[:, :hd].reshape(bt, s, hd)
    k = qkv[:, hd:2 * hd].reshape(bt, s, hd)
    v = qkv[:, 2 * hd:].reshape(bt, s, hd)

    # --- attention (scores are tiny SxS; keep batched via einsum) ---
    scale = 1.0 / (float(hd) ** 0.5)             # folded as a constant multiply
    sc = jnp.einsum('bqd,bkd->bqk',
                    q.astype(jnp.bfloat16), k.astype(jnp.bfloat16),
                    preferred_element_type=jnp.float32) * scale
    sc = sc - jnp.max(sc, axis=-1, keepdims=True)
    p = jnp.exp(sc)                                                  # f32, EUP
    a = p * pl.reciprocal(jnp.sum(p, axis=-1, keepdims=True), approx=True)
    ctx = jnp.einsum('bqk,bkd->bqd',
                     a.astype(jnp.bfloat16), v.astype(jnp.bfloat16),
                     preferred_element_type=jnp.float32)             # (Bt,S,H)
    attn = jnp.dot(ctx.reshape(m, hd).astype(jnp.bfloat16), wo,
                   preferred_element_type=jnp.float32)               # (M, H)
    hx = _layernorm(hf + attn)                                       # f32

    # --- FFN ---
    ff_in = jnp.dot(hx.astype(jnp.bfloat16), w1,
                    preferred_element_type=jnp.float32)              # (M, FFN)
    ff = jnp.dot(_gelu(ff_in).astype(jnp.bfloat16), w2,
                 preferred_element_type=jnp.float32)                 # (M, H)
    return _layernorm(hx + ff)                                       # (M, H) f32


def ensemble_kernel(h1_ref, h2_ref,
                    wqkv1, wo1, w11, w21, wout1,
                    wqkv2, wo2, w12, w22, wout2,
                    o_ref):
    # Whole (Bt, S, H) batch-block per grid step; two independent encoder
    # chains traced into one body so the scheduler can interleave them.
    bt, s, vdim = o_ref.shape
    hx1 = _bert_encoder(h1_ref[...], wqkv1[...], wo1[...], w11[...], w21[...])
    hx2 = _bert_encoder(h2_ref[...], wqkv2[...], wo2[...], w12[...], w22[...])

    # essemble_bert forward: logits1 + logits2.  The ensemble add is folded
    # into f32 accumulation over the two vocab matmuls; one lane-dense store.
    logits = jnp.dot(hx1.astype(jnp.bfloat16), wout1[...],
                     preferred_element_type=jnp.float32)
    logits = logits + jnp.dot(hx2.astype(jnp.bfloat16), wout2[...],
                              preferred_element_type=jnp.float32)
    o_ref[...] = logits.reshape(bt, s, vdim)


# ------------------------------- wrapper -----------------------------------

def essemble_bert_forward(x, segment_label, params1, params2, *, block_b=None):
    """x, segment_label: (B, S) int32. Returns (B, S, vocab) float32."""
    B, S = x.shape
    H = params1["wq"].shape[0]
    V = params1["wout"].shape[1]
    bt = B if block_b is None else block_b       # fold whole batch into one block

    def embed(p):
        # embedding gathers + adds: plain-JAX glue (XLA fuses into one pass);
        # hand the kernel bf16 activations to halve the HBM->VMEM DMA.
        h = p["tok_emb"][x] + p["seg_emb"][segment_label] + p["pos_emb"][None]
        return h.astype(jnp.bfloat16)

    def pack_weights(p):
        # fuse Q/K/V into one (H, 3H) matrix; feed all weights as bf16
        wqkv = jnp.concatenate([p["wq"], p["wk"], p["wv"]], axis=1)
        return [w.astype(jnp.bfloat16)
                for w in (wqkv, p["wo"], p["w1"], p["w2"], p["wout"])]

    h1 = embed(params1)                          # (B, S, H) bf16
    h2 = embed(params2)
    w1s = pack_weights(params1)
    w2s = pack_weights(params2)

    act_spec = pl.BlockSpec((bt, S, H), lambda b: (b, 0, 0))
    out_spec = pl.BlockSpec((bt, S, V), lambda b: (b, 0, 0))

    def wspec(w):
        return pl.BlockSpec(w.shape, lambda b, _n=w.ndim: (0,) * _n)

    in_specs = ([act_spec, act_spec]
                + [wspec(w) for w in w1s]
                + [wspec(w) for w in w2s])

    out = pl.pallas_call(
        ensemble_kernel,
        out_shape=jax.ShapeDtypeStruct((B, S, V), jnp.float32),
        grid_spec=pltpu.PrefetchScalarGridSpec(
            num_scalar_prefetch=0,
            grid=(pl.cdiv(B, bt),),
            in_specs=in_specs,
            out_specs=out_spec,
        ),
        compiler_params=pltpu.CompilerParams(
            dimension_semantics=("parallel",)),
    )(h1, h2, *w1s, *w2s)
    return out


# --------------------------- parameter creation ----------------------------

def make_bert_params(key, *, vocab_size, n_segments, seq_len, hidden, ffn, vocab):
    ks = jax.random.split(key, 10)
    s = 0.02
    return {
        "tok_emb": s * jax.random.normal(ks[0], (vocab_size, hidden), jnp.float32),
        "seg_emb": s * jax.random.normal(ks[1], (n_segments, hidden), jnp.float32),
        "pos_emb": s * jax.random.normal(ks[2], (seq_len, hidden), jnp.float32),
        "wq": s * jax.random.normal(ks[3], (hidden, hidden), jnp.float32),
        "wk": s * jax.random.normal(ks[4], (hidden, hidden), jnp.float32),
        "wv": s * jax.random.normal(ks[5], (hidden, hidden), jnp.float32),
        "wo": s * jax.random.normal(ks[6], (hidden, hidden), jnp.float32),
        "w1": s * jax.random.normal(ks[7], (hidden, ffn), jnp.float32),
        "w2": s * jax.random.normal(ks[8], (ffn, hidden), jnp.float32),
        "wout": s * jax.random.normal(ks[9], (hidden, vocab), jnp.float32),
    }


# ---------------------------------- main ------------------------------------

if __name__ == "__main__":
    # Lane (last) dims are 128-multiples: H=128, FFN=256, VOCAB_OUT=128.
    B, S, H, FFN = 2, 8, 128, 256
    VOCAB_IN, N_SEG, VOCAB_OUT = 100, 3, 128

    root = jax.random.PRNGKey(0)
    k_x, k_seg, k_p1, k_p2 = jax.random.split(root, 4)

    x = jax.random.randint(k_x, (B, S), 0, VOCAB_IN, dtype=jnp.int32)
    segment_label = jax.random.randint(k_seg, (B, S), 0, N_SEG, dtype=jnp.int32)

    params1 = make_bert_params(k_p1, vocab_size=VOCAB_IN, n_segments=N_SEG,
                               seq_len=S, hidden=H, ffn=FFN, vocab=VOCAB_OUT)
    params2 = make_bert_params(k_p2, vocab_size=VOCAB_IN, n_segments=N_SEG,
                               seq_len=S, hidden=H, ffn=FFN, vocab=VOCAB_OUT)

    out = essemble_bert_forward(x, segment_label, params1, params2)
    jax.block_until_ready(out)
    assert out.shape == (B, S, VOCAB_OUT)
    print("KERNEL_OK")
</pallas_src>

<mosaic_0001>
module attributes {stable_mosaic.version = 11 : i64} {
  func.func @ensemble_kernel(%arg0: i32, %arg1: memref<2x8x128xbf16, #tpu.memory_space<vmem>>, %arg2: memref<2x8x128xbf16, #tpu.memory_space<vmem>>, %arg3: memref<128x384xbf16, #tpu.memory_space<vmem>>, %arg4: memref<128x128xbf16, #tpu.memory_space<vmem>>, %arg5: memref<128x256xbf16, #tpu.memory_space<vmem>>, %arg6: memref<256x128xbf16, #tpu.memory_space<vmem>>, %arg7: memref<128x128xbf16, #tpu.memory_space<vmem>>, %arg8: memref<128x384xbf16, #tpu.memory_space<vmem>>, %arg9: memref<128x128xbf16, #tpu.memory_space<vmem>>, %arg10: memref<128x256xbf16, #tpu.memory_space<vmem>>, %arg11: memref<256x128xbf16, #tpu.memory_space<vmem>>, %arg12: memref<128x128xbf16, #tpu.memory_space<vmem>>, %arg13: memref<2x8x128xf32, #tpu.memory_space<vmem>>) attributes {dimension_semantics = [#tpu.dimension_semantics<parallel>], iteration_bounds = array<i64: 1>, scalar_prefetch = 0 : i64, scratch_operands = 0 : i64, tpu.core_type = #tpu.core_type<tc>, window_params = [{transform_indices = @transform_0, window_bounds = array<i64: 2, 8, 128>}, {transform_indices = @transform_1, window_bounds = array<i64: 2, 8, 128>}, {pipeline_mode = #tpu.pipeline_mode<synchronous>, transform_indices = @transform_2, window_bounds = array<i64: 128, 384>}, {pipeline_mode = #tpu.pipeline_mode<synchronous>, transform_indices = @transform_3, window_bounds = array<i64: 128, 128>}, {pipeline_mode = #tpu.pipeline_mode<synchronous>, transform_indices = @transform_4, window_bounds = array<i64: 128, 256>}, {pipeline_mode = #tpu.pipeline_mode<synchronous>, transform_indices = @transform_5, window_bounds = array<i64: 256, 128>}, {pipeline_mode = #tpu.pipeline_mode<synchronous>, transform_indices = @transform_6, window_bounds = array<i64: 128, 128>}, {pipeline_mode = #tpu.pipeline_mode<synchronous>, transform_indices = @transform_7, window_bounds = array<i64: 128, 384>}, {pipeline_mode = #tpu.pipeline_mode<synchronous>, transform_indices = @transform_8, window_bounds = array<i64: 128, 128>}, {pipeline_mode = #tpu.pipeline_mode<synchronous>, transform_indices = @transform_9, window_bounds = array<i64: 128, 256>}, {pipeline_mode = #tpu.pipeline_mode<synchronous>, transform_indices = @transform_10, window_bounds = array<i64: 256, 128>}, {pipeline_mode = #tpu.pipeline_mode<synchronous>, transform_indices = @transform_11, window_bounds = array<i64: 128, 128>}, {transform_indices = @transform_12, window_bounds = array<i64: 2, 8, 128>}]} {
    %c0 = arith.constant 0 : index
    %c0_0 = arith.constant 0 : index
    %c0_1 = arith.constant 0 : index
    %0 = vector.load %arg1[%c0, %c0_0, %c0_1] : memref<2x8x128xbf16, #tpu.memory_space<vmem>>, vector<2x8x128xbf16>
    %c0_2 = arith.constant 0 : index
    %c0_3 = arith.constant 0 : index
    %1 = vector.load %arg3[%c0_2, %c0_3] : memref<128x384xbf16, #tpu.memory_space<vmem>>, vector<128x384xbf16>
    %c0_4 = arith.constant 0 : index
    %c0_5 = arith.constant 0 : index
    %2 = vector.load %arg4[%c0_4, %c0_5] : memref<128x128xbf16, #tpu.memory_space<vmem>>, vector<128x128xbf16>
    %c0_6 = arith.constant 0 : index
    %c0_7 = arith.constant 0 : index
    %3 = vector.load %arg5[%c0_6, %c0_7] : memref<128x256xbf16, #tpu.memory_space<vmem>>, vector<128x256xbf16>
    %c0_8 = arith.constant 0 : index
    %c0_9 = arith.constant 0 : index
    %4 = vector.load %arg6[%c0_8, %c0_9] : memref<256x128xbf16, #tpu.memory_space<vmem>>, vector<256x128xbf16>
    %5 = vector.shape_cast %0 : vector<2x8x128xbf16> to vector<16x128xbf16>
    %6 = arith.extf %5 : vector<16x128xbf16> to vector<16x128xf32>
    %cst = arith.constant dense<0.000000e+00> : vector<16x384xf32>
    %7 = tpu.matmul %5, %1, %cst {dimension_numbers = #tpu.dot_dimension_numbers<[1], [0], [0], [1], [0, 0, 1, 1], [], []>} : vector<16x128xbf16>, vector<128x384xbf16>, vector<16x384xf32> -> vector<16x384xf32>
    %8 = vector.extract_strided_slice %7 {offsets = [0, 0], sizes = [16, 128], strides = [1, 1]} : vector<16x384xf32> to vector<16x128xf32>
    %9 = vector.shape_cast %8 : vector<16x128xf32> to vector<2x8x128xf32>
    %10 = vector.extract_strided_slice %7 {offsets = [0, 128], sizes = [16, 128], strides = [1, 1]} : vector<16x384xf32> to vector<16x128xf32>
    %11 = vector.shape_cast %10 : vector<16x128xf32> to vector<2x8x128xf32>
    %12 = vector.extract_strided_slice %7 {offsets = [0, 256], sizes = [16, 128], strides = [1, 1]} : vector<16x384xf32> to vector<16x128xf32>
    %13 = vector.shape_cast %12 : vector<16x128xf32> to vector<2x8x128xf32>
    %14 = arith.truncf %9 : vector<2x8x128xf32> to vector<2x8x128xbf16>
    %15 = arith.truncf %11 : vector<2x8x128xf32> to vector<2x8x128xbf16>
    "tpu.trace_start"() <{level = 10 : i32, message = "bqd,bkd->bqk"}> : () -> ()
    %cst_10 = arith.constant dense<0.000000e+00> : vector<2x8x8xf32>
    %16 = tpu.matmul %14, %15, %cst_10 {dimension_numbers = #tpu.dot_dimension_numbers<[2], [2], [1], [1], [0, 0, 0, 1, 1, 1], [0], [0]>} : vector<2x8x128xbf16>, vector<2x8x128xbf16>, vector<2x8x8xf32> -> vector<2x8x8xf32>
    "tpu.trace_stop"() : () -> ()
    %cst_11 = arith.constant 0.0883883461 : f32
    %17 = vector.broadcast %cst_11 : f32 to vector<2x8x8xf32>
    %18 = arith.mulf %16, %17 : vector<2x8x8xf32>
    %cst_12 = arith.constant dense<0xFF800000> : vector<2x8xf32>
    %19 = vector.multi_reduction <maximumf>, %18, %cst_12 [2] : vector<2x8x8xf32> to vector<2x8xf32>
    %20 = vector.shape_cast %19 : vector<2x8xf32> to vector<2x8x1xf32>
    %21 = vector.broadcast %20 : vector<2x8x1xf32> to vector<2x8x8xf32>
    %22 = arith.subf %18, %21 : vector<2x8x8xf32>
    %23 = math.exp %22 : vector<2x8x8xf32>
    %cst_13 = arith.constant dense<0.000000e+00> : vector<2x8xf32>
    %24 = vector.multi_reduction <add>, %23, %cst_13 [2] : vector<2x8x8xf32> to vector<2x8xf32>
    %25 = vector.shape_cast %24 : vector<2x8xf32> to vector<2x8x1xf32>
    %26 = tpu.reciprocal %25 {approx = true} : vector<2x8x1xf32> -> vector<2x8x1xf32>
    %27 = vector.broadcast %26 : vector<2x8x1xf32> to vector<2x8x8xf32>
    %28 = arith.mulf %23, %27 : vector<2x8x8xf32>
    %29 = arith.truncf %28 : vector<2x8x8xf32> to vector<2x8x8xbf16>
    %30 = arith.truncf %13 : vector<2x8x128xf32> to vector<2x8x128xbf16>
    "tpu.trace_start"() <{level = 10 : i32, message = "bqk,bkd->bqd"}> : () -> ()
    %cst_14 = arith.constant dense<0.000000e+00> : vector<2x8x128xf32>
    %31 = tpu.matmul %29, %30, %cst_14 {dimension_numbers = #tpu.dot_dimension_numbers<[2], [1], [1], [2], [0, 0, 0, 1, 1, 2], [0], [0]>} : vector<2x8x8xbf16>, vector<2x8x128xbf16>, vector<2x8x128xf32> -> vector<2x8x128xf32>
    "tpu.trace_stop"() : () -> ()
    %32 = vector.shape_cast %31 : vector<2x8x128xf32> to vector<16x128xf32>
    %33 = arith.truncf %32 : vector<16x128xf32> to vector<16x128xbf16>
    %cst_15 = arith.constant dense<0.000000e+00> : vector<16x128xf32>
    %34 = tpu.matmul %33, %2, %cst_15 {dimension_numbers = #tpu.dot_dimension_numbers<[1], [0], [0], [1], [0, 0, 1, 1], [], []>} : vector<16x128xbf16>, vector<128x128xbf16>, vector<16x128xf32> -> vector<16x128xf32>
    %35 = arith.addf %6, %34 : vector<16x128xf32>
    %cst_16 = arith.constant dense<0.000000e+00> : vector<16xf32>
    %36 = vector.multi_reduction <add>, %35, %cst_16 [1] : vector<16x128xf32> to vector<16xf32>
    %37 = vector.shape_cast %36 : vector<16xf32> to vector<16x1xf32>
    %cst_17 = arith.constant 1.280000e+02 : f32
    %38 = vector.broadcast %cst_17 : f32 to vector<16x1xf32>
    %39 = arith.divf %37, %38 : vector<16x1xf32>
    %40 = vector.broadcast %39 : vector<16x1xf32> to vector<16x128xf32>
    %41 = arith.subf %35, %40 : vector<16x128xf32>
    %42 = vector.broadcast %39 : vector<16x1xf32> to vector<16x128xf32>
    %43 = arith.subf %35, %42 : vector<16x128xf32>
    %44 = arith.mulf %41, %43 : vector<16x128xf32>
    %cst_18 = arith.constant dense<0.000000e+00> : vector<16xf32>
    %45 = vector.multi_reduction <add>, %44, %cst_18 [1] : vector<16x128xf32> to vector<16xf32>
    %46 = vector.shape_cast %45 : vector<16xf32> to vector<16x1xf32>
    %cst_19 = arith.constant 1.280000e+02 : f32
    %47 = vector.broadcast %cst_19 : f32 to vector<16x1xf32>
    %48 = arith.divf %46, %47 : vector<16x1xf32>
    %49 = vector.broadcast %39 : vector<16x1xf32> to vector<16x128xf32>
    %50 = arith.subf %35, %49 : vector<16x128xf32>
    %cst_20 = arith.constant 9.99999996E-13 : f32
    %51 = vector.broadcast %cst_20 : f32 to vector<16x1xf32>
    %52 = arith.addf %48, %51 : vector<16x1xf32>
    %53 = math.rsqrt %52 : vector<16x1xf32>
    %54 = vector.broadcast %53 : vector<16x1xf32> to vector<16x128xf32>
    %55 = arith.mulf %50, %54 : vector<16x128xf32>
    %56 = arith.truncf %55 : vector<16x128xf32> to vector<16x128xbf16>
    %cst_21 = arith.constant dense<0.000000e+00> : vector<16x256xf32>
    %57 = tpu.matmul %56, %3, %cst_21 {dimension_numbers = #tpu.dot_dimension_numbers<[1], [0], [0], [1], [0, 0, 1, 1], [], []>} : vector<16x128xbf16>, vector<128x256xbf16>, vector<16x256xf32> -> vector<16x256xf32>
    %cst_22 = arith.constant 5.000000e-01 : f32
    %58 = vector.broadcast %cst_22 : f32 to vector<16x256xf32>
    %59 = arith.mulf %58, %57 : vector<16x256xf32>
    %cst_23 = arith.constant 4.471500e-02 : f32
    %60 = vector.broadcast %cst_23 : f32 to vector<16x256xf32>
    %61 = arith.mulf %60, %57 : vector<16x256xf32>
    %62 = arith.mulf %61, %57 : vector<16x256xf32>
    %63 = arith.mulf %62, %57 : vector<16x256xf32>
    %64 = arith.addf %57, %63 : vector<16x256xf32>
    %cst_24 = arith.constant 0.797884583 : f32
    %65 = vector.broadcast %cst_24 : f32 to vector<16x256xf32>
    %66 = arith.mulf %65, %64 : vector<16x256xf32>
    %67 = math.tanh %66 : vector<16x256xf32>
    %cst_25 = arith.constant 1.000000e+00 : f32
    %68 = vector.broadcast %cst_25 : f32 to vector<16x256xf32>
    %69 = arith.addf %68, %67 : vector<16x256xf32>
    %70 = arith.mulf %59, %69 : vector<16x256xf32>
    %71 = arith.truncf %70 : vector<16x256xf32> to vector<16x256xbf16>
    %cst_26 = arith.constant dense<0.000000e+00> : vector<16x128xf32>
    %72 = tpu.matmul %71, %4, %cst_26 {dimension_numbers = #tpu.dot_dimension_numbers<[1], [0], [0], [1], [0, 0, 1, 1], [], []>} : vector<16x256xbf16>, vector<256x128xbf16>, vector<16x128xf32> -> vector<16x128xf32>
    %73 = arith.addf %55, %72 : vector<16x128xf32>
    %cst_27 = arith.constant dense<0.000000e+00> : vector<16xf32>
    %74 = vector.multi_reduction <add>, %73, %cst_27 [1] : vector<16x128xf32> to vector<16xf32>
    %75 = vector.shape_cast %74 : vector<16xf32> to vector<16x1xf32>
    %cst_28 = arith.constant 1.280000e+02 : f32
    %76 = vector.broadcast %cst_28 : f32 to vector<16x1xf32>
    %77 = arith.divf %75, %76 : vector<16x1xf32>
    %78 = vector.broadcast %77 : vector<16x1xf32> to vector<16x128xf32>
    %79 = arith.subf %73, %78 : vector<16x128xf32>
    %80 = vector.broadcast %77 : vector<16x1xf32> to vector<16x128xf32>
    %81 = arith.subf %73, %80 : vector<16x128xf32>
    %82 = arith.mulf %79, %81 : vector<16x128xf32>
    %cst_29 = arith.constant dense<0.000000e+00> : vector<16xf32>
    %83 = vector.multi_reduction <add>, %82, %cst_29 [1] : vector<16x128xf32> to vector<16xf32>
    %84 = vector.shape_cast %83 : vector<16xf32> to vector<16x1xf32>
    %cst_30 = arith.constant 1.280000e+02 : f32
    %85 = vector.broadcast %cst_30 : f32 to vector<16x1xf32>
    %86 = arith.divf %84, %85 : vector<16x1xf32>
    %87 = vector.broadcast %77 : vector<16x1xf32> to vector<16x128xf32>
    %88 = arith.subf %73, %87 : vector<16x128xf32>
    %cst_31 = arith.constant 9.99999996E-13 : f32
    %89 = vector.broadcast %cst_31 : f32 to vector<16x1xf32>
    %90 = arith.addf %86, %89 : vector<16x1xf32>
    %91 = math.rsqrt %90 : vector<16x1xf32>
    %92 = vector.broadcast %91 : vector<16x1xf32> to vector<16x128xf32>
    %93 = arith.mulf %88, %92 : vector<16x128xf32>
    %c0_32 = arith.constant 0 : index
    %c0_33 = arith.constant 0 : index
    %c0_34 = arith.constant 0 : index
    %94 = vector.load %arg2[%c0_32, %c0_33, %c0_34] : memref<2x8x128xbf16, #tpu.memory_space<vmem>>, vector<2x8x128xbf16>
    %c0_35 = arith.constant 0 : index
    %c0_36 = arith.constant 0 : index
    %95 = vector.load %arg8[%c0_35, %c0_36] : memref<128x384xbf16, #tpu.memory_space<vmem>>, vector<128x384xbf16>
    %c0_37 = arith.constant 0 : index
    %c0_38 = arith.constant 0 : index
    %96 = vector.load %arg9[%c0_37, %c0_38] : memref<128x128xbf16, #tpu.memory_space<vmem>>, vector<128x128xbf16>
    %c0_39 = arith.constant 0 : index
    %c0_40 = arith.constant 0 : index
    %97 = vector.load %arg10[%c0_39, %c0_40] : memref<128x256xbf16, #tpu.memory_space<vmem>>, vector<128x256xbf16>
    %c0_41 = arith.constant 0 : index
    %c0_42 = arith.constant 0 : index
    %98 = vector.load %arg11[%c0_41, %c0_42] : memref<256x128xbf16, #tpu.memory_space<vmem>>, vector<256x128xbf16>
    %99 = vector.shape_cast %94 : vector<2x8x128xbf16> to vector<16x128xbf16>
    %100 = arith.extf %99 : vector<16x128xbf16> to vector<16x128xf32>
    %cst_43 = arith.constant dense<0.000000e+00> : vector<16x384xf32>
    %101 = tpu.matmul %99, %95, %cst_43 {dimension_numbers = #tpu.dot_dimension_numbers<[1], [0], [0], [1], [0, 0, 1, 1], [], []>} : vector<16x128xbf16>, vector<128x384xbf16>, vector<16x384xf32> -> vector<16x384xf32>
    %102 = vector.extract_strided_slice %101 {offsets = [0, 0], sizes = [16, 128], strides = [1, 1]} : vector<16x384xf32> to vector<16x128xf32>
    %103 = vector.shape_cast %102 : vector<16x128xf32> to vector<2x8x128xf32>
    %104 = vector.extract_strided_slice %101 {offsets = [0, 128], sizes = [16, 128], strides = [1, 1]} : vector<16x384xf32> to vector<16x128xf32>
    %105 = vector.shape_cast %104 : vector<16x128xf32> to vector<2x8x128xf32>
    %106 = vector.extract_strided_slice %101 {offsets = [0, 256], sizes = [16, 128], strides = [1, 1]} : vector<16x384xf32> to vector<16x128xf32>
    %107 = vector.shape_cast %106 : vector<16x128xf32> to vector<2x8x128xf32>
    %108 = arith.truncf %103 : vector<2x8x128xf32> to vector<2x8x128xbf16>
    %109 = arith.truncf %105 : vector<2x8x128xf32> to vector<2x8x128xbf16>
    "tpu.trace_start"() <{level = 10 : i32, message = "bqd,bkd->bqk"}> : () -> ()
    %cst_44 = arith.constant dense<0.000000e+00> : vector<2x8x8xf32>
    %110 = tpu.matmul %108, %109, %cst_44 {dimension_numbers = #tpu.dot_dimension_numbers<[2], [2], [1], [1], [0, 0, 0, 1, 1, 1], [0], [0]>} : vector<2x8x128xbf16>, vector<2x8x128xbf16>, vector<2x8x8xf32> -> vector<2x8x8xf32>
    "tpu.trace_stop"() : () -> ()
    %cst_45 = arith.constant 0.0883883461 : f32
    %111 = vector.broadcast %cst_45 : f32 to vector<2x8x8xf32>
    %112 = arith.mulf %110, %111 : vector<2x8x8xf32>
    %cst_46 = arith.constant dense<0xFF800000> : vector<2x8xf32>
    %113 = vector.multi_reduction <maximumf>, %112, %cst_46 [2] : vector<2x8x8xf32> to vector<2x8xf32>
    %114 = vector.shape_cast %113 : vector<2x8xf32> to vector<2x8x1xf32>
    %115 = vector.broadcast %114 : vector<2x8x1xf32> to vector<2x8x8xf32>
    %116 = arith.subf %112, %115 : vector<2x8x8xf32>
    %117 = math.exp %116 : vector<2x8x8xf32>
    %cst_47 = arith.constant dense<0.000000e+00> : vector<2x8xf32>
    %118 = vector.multi_reduction <add>, %117, %cst_47 [2] : vector<2x8x8xf32> to vector<2x8xf32>
    %119 = vector.shape_cast %118 : vector<2x8xf32> to vector<2x8x1xf32>
    %120 = tpu.reciprocal %119 {approx = true} : vector<2x8x1xf32> -> vector<2x8x1xf32>
    %121 = vector.broadcast %120 : vector<2x8x1xf32> to vector<2x8x8xf32>
    %122 = arith.mulf %117, %121 : vector<2x8x8xf32>
    %123 = arith.truncf %122 : vector<2x8x8xf32> to vector<2x8x8xbf16>
    %124 = arith.truncf %107 : vector<2x8x128xf32> to vector<2x8x128xbf16>
    "tpu.trace_start"() <{level = 10 : i32, message = "bqk,bkd->bqd"}> : () -> ()
    %cst_48 = arith.constant dense<0.000000e+00> : vector<2x8x128xf32>
    %125 = tpu.matmul %123, %124, %cst_48 {dimension_numbers = #tpu.dot_dimension_numbers<[2], [1], [1], [2], [0, 0, 0, 1, 1, 2], [0], [0]>} : vector<2x8x8xbf16>, vector<2x8x128xbf16>, vector<2x8x128xf32> -> vector<2x8x128xf32>
    "tpu.trace_stop"() : () -> ()
    %126 = vector.shape_cast %125 : vector<2x8x128xf32> to vector<16x128xf32>
    %127 = arith.truncf %126 : vector<16x128xf32> to vector<16x128xbf16>
    %cst_49 = arith.constant dense<0.000000e+00> : vector<16x128xf32>
    %128 = tpu.matmul %127, %96, %cst_49 {dimension_numbers = #tpu.dot_dimension_numbers<[1], [0], [0], [1], [0, 0, 1, 1], [], []>} : vector<16x128xbf16>, vector<128x128xbf16>, vector<16x128xf32> -> vector<16x128xf32>
    %129 = arith.addf %100, %128 : vector<16x128xf32>
    %cst_50 = arith.constant dense<0.000000e+00> : vector<16xf32>
    %130 = vector.multi_reduction <add>, %129, %cst_50 [1] : vector<16x128xf32> to vector<16xf32>
    %131 = vector.shape_cast %130 : vector<16xf32> to vector<16x1xf32>
    %cst_51 = arith.constant 1.280000e+02 : f32
    %132 = vector.broadcast %cst_51 : f32 to vector<16x1xf32>
    %133 = arith.divf %131, %132 : vector<16x1xf32>
    %134 = vector.broadcast %133 : vector<16x1xf32> to vector<16x128xf32>
    %135 = arith.subf %129, %134 : vector<16x128xf32>
    %136 = vector.broadcast %133 : vector<16x1xf32> to vector<16x128xf32>
    %137 = arith.subf %129, %136 : vector<16x128xf32>
    %138 = arith.mulf %135, %137 : vector<16x128xf32>
    %cst_52 = arith.constant dense<0.000000e+00> : vector<16xf32>
    %139 = vector.multi_reduction <add>, %138, %cst_52 [1] : vector<16x128xf32> to vector<16xf32>
    %140 = vector.shape_cast %139 : vector<16xf32> to vector<16x1xf32>
    %cst_53 = arith.constant 1.280000e+02 : f32
    %141 = vector.broadcast %cst_53 : f32 to vector<16x1xf32>
    %142 = arith.divf %140, %141 : vector<16x1xf32>
    %143 = vector.broadcast %133 : vector<16x1xf32> to vector<16x128xf32>
    %144 = arith.subf %129, %143 : vector<16x128xf32>
    %cst_54 = arith.constant 9.99999996E-13 : f32
    %145 = vector.broadcast %cst_54 : f32 to vector<16x1xf32>
    %146 = arith.addf %142, %145 : vector<16x1xf32>
    %147 = math.rsqrt %146 : vector<16x1xf32>
    %148 = vector.broadcast %147 : vector<16x1xf32> to vector<16x128xf32>
    %149 = arith.mulf %144, %148 : vector<16x128xf32>
    %150 = arith.truncf %149 : vector<16x128xf32> to vector<16x128xbf16>
    %cst_55 = arith.constant dense<0.000000e+00> : vector<16x256xf32>
    %151 = tpu.matmul %150, %97, %cst_55 {dimension_numbers = #tpu.dot_dimension_numbers<[1], [0], [0], [1], [0, 0, 1, 1], [], []>} : vector<16x128xbf16>, vector<128x256xbf16>, vector<16x256xf32> -> vector<16x256xf32>
    %cst_56 = arith.constant 5.000000e-01 : f32
    %152 = vector.broadcast %cst_56 : f32 to vector<16x256xf32>
    %153 = arith.mulf %152, %151 : vector<16x256xf32>
    %cst_57 = arith.constant 4.471500e-02 : f32
    %154 = vector.broadcast %cst_57 : f32 to vector<16x256xf32>
    %155 = arith.mulf %154, %151 : vector<16x256xf32>
    %156 = arith.mulf %155, %151 : vector<16x256xf32>
    %157 = arith.mulf %156, %151 : vector<16x256xf32>
    %158 = arith.addf %151, %157 : vector<16x256xf32>
    %cst_58 = arith.constant 0.797884583 : f32
    %159 = vector.broadcast %cst_58 : f32 to vector<16x256xf32>
    %160 = arith.mulf %159, %158 : vector<16x256xf32>
    %161 = math.tanh %160 : vector<16x256xf32>
    %cst_59 = arith.constant 1.000000e+00 : f32
    %162 = vector.broadcast %cst_59 : f32 to vector<16x256xf32>
    %163 = arith.addf %162, %161 : vector<16x256xf32>
    %164 = arith.mulf %153, %163 : vector<16x256xf32>
    %165 = arith.truncf %164 : vector<16x256xf32> to vector<16x256xbf16>
    %cst_60 = arith.constant dense<0.000000e+00> : vector<16x128xf32>
    %166 = tpu.matmul %165, %98, %cst_60 {dimension_numbers = #tpu.dot_dimension_numbers<[1], [0], [0], [1], [0, 0, 1, 1], [], []>} : vector<16x256xbf16>, vector<256x128xbf16>, vector<16x128xf32> -> vector<16x128xf32>
    %167 = arith.addf %149, %166 : vector<16x128xf32>
    %cst_61 = arith.constant dense<0.000000e+00> : vector<16xf32>
    %168 = vector.multi_reduction <add>, %167, %cst_61 [1] : vector<16x128xf32> to vector<16xf32>
    %169 = vector.shape_cast %168 : vector<16xf32> to vector<16x1xf32>
    %cst_62 = arith.constant 1.280000e+02 : f32
    %170 = vector.broadcast %cst_62 : f32 to vector<16x1xf32>
    %171 = arith.divf %169, %170 : vector<16x1xf32>
    %172 = vector.broadcast %171 : vector<16x1xf32> to vector<16x128xf32>
    %173 = arith.subf %167, %172 : vector<16x128xf32>
    %174 = vector.broadcast %171 : vector<16x1xf32> to vector<16x128xf32>
    %175 = arith.subf %167, %174 : vector<16x128xf32>
    %176 = arith.mulf %173, %175 : vector<16x128xf32>
    %cst_63 = arith.constant dense<0.000000e+00> : vector<16xf32>
    %177 = vector.multi_reduction <add>, %176, %cst_63 [1] : vector<16x128xf32> to vector<16xf32>
    %178 = vector.shape_cast %177 : vector<16xf32> to vector<16x1xf32>
    %cst_64 = arith.constant 1.280000e+02 : f32
    %179 = vector.broadcast %cst_64 : f32 to vector<16x1xf32>
    %180 = arith.divf %178, %179 : vector<16x1xf32>
    %181 = vector.broadcast %171 : vector<16x1xf32> to vector<16x128xf32>
    %182 = arith.subf %167, %181 : vector<16x128xf32>
    %cst_65 = arith.constant 9.99999996E-13 : f32
    %183 = vector.broadcast %cst_65 : f32 to vector<16x1xf32>
    %184 = arith.addf %180, %183 : vector<16x1xf32>
    %185 = math.rsqrt %184 : vector<16x1xf32>
    %186 = vector.broadcast %185 : vector<16x1xf32> to vector<16x128xf32>
    %187 = arith.mulf %182, %186 : vector<16x128xf32>
    %188 = arith.truncf %93 : vector<16x128xf32> to vector<16x128xbf16>
    %c0_66 = arith.constant 0 : index
    %c0_67 = arith.constant 0 : index
    %189 = vector.load %arg7[%c0_66, %c0_67] : memref<128x128xbf16, #tpu.memory_space<vmem>>, vector<128x128xbf16>
    %cst_68 = arith.constant dense<0.000000e+00> : vector<16x128xf32>
    %190 = tpu.matmul %188, %189, %cst_68 {dimension_numbers = #tpu.dot_dimension_numbers<[1], [0], [0], [1], [0, 0, 1, 1], [], []>} : vector<16x128xbf16>, vector<128x128xbf16>, vector<16x128xf32> -> vector<16x128xf32>
    %191 = arith.truncf %187 : vector<16x128xf32> to vector<16x128xbf16>
    %c0_69 = arith.constant 0 : index
    %c0_70 = arith.constant 0 : index
    %192 = vector.load %arg12[%c0_69, %c0_70] : memref<128x128xbf16, #tpu.memory_space<vmem>>, vector<128x128xbf16>
    %cst_71 = arith.constant dense<0.000000e+00> : vector<16x128xf32>
    %193 = tpu.matmul %191, %192, %cst_71 {dimension_numbers = #tpu.dot_dimension_numbers<[1], [0], [0], [1], [0, 0, 1, 1], [], []>} : vector<16x128xbf16>, vector<128x128xbf16>, vector<16x128xf32> -> vector<16x128xf32>
    %194 = arith.addf %190, %193 : vector<16x128xf32>
    %195 = vector.shape_cast %194 : vector<16x128xf32> to vector<2x8x128xf32>
    %c0_72 = arith.constant 0 : index
    %c0_73 = arith.constant 0 : index
    %c0_74 = arith.constant 0 : index
    %196 = vector.load %arg13[%c0_72, %c0_73, %c0_74] : memref<2x8x128xf32, #tpu.memory_space<vmem>>, vector<2x8x128xf32>
    tpu.vector_store %arg13[%c0_72, %c0_73, %c0_74], %195 {strides = array<i32>} : memref<2x8x128xf32, #tpu.memory_space<vmem>>, vector<2x8x128xf32>,
    return
  }
  func.func @transform_0(%arg0: i32) -> (i32, i32, i32) {
    %c0_i32 = arith.constant 0 : i32
    %c0_i32_0 = arith.constant 0 : i32
    %c0_i32_1 = arith.constant 0 : i32
    return %arg0, %c0_i32, %c0_i32_0 : i32, i32, i32
  }
  func.func @transform_1(%arg0: i32) -> (i32, i32, i32) {
    %c0_i32 = arith.constant 0 : i32
    %c0_i32_0 = arith.constant 0 : i32
    %c0_i32_1 = arith.constant 0 : i32
    return %arg0, %c0_i32, %c0_i32_0 : i32, i32, i32
  }
  func.func @transform_2(%arg0: i32) -> (i32, i32) {
    %c0_i32 = arith.constant 0 : i32
    %c0_i32_0 = arith.constant 0 : i32
    %c0_i32_1 = arith.constant 0 : i32
    return %c0_i32, %c0_i32_0 : i32, i32
  }
  func.func @transform_3(%arg0: i32) -> (i32, i32) {
    %c0_i32 = arith.constant 0 : i32
    %c0_i32_0 = arith.constant 0 : i32
    %c0_i32_1 = arith.constant 0 : i32
    return %c0_i32, %c0_i32_0 : i32, i32
  }
  func.func @transform_4(%arg0: i32) -> (i32, i32) {
    %c0_i32 = arith.constant 0 : i32
    %c0_i32_0 = arith.constant 0 : i32
    %c0_i32_1 = arith.constant 0 : i32
    return %c0_i32, %c0_i32_0 : i32, i32
  }
  func.func @transform_5(%arg0: i32) -> (i32, i32) {
    %c0_i32 = arith.constant 0 : i32
    %c0_i32_0 = arith.constant 0 : i32
    %c0_i32_1 = arith.constant 0 : i32
    return %c0_i32, %c0_i32_0 : i32, i32
  }
  func.func @transform_6(%arg0: i32) -> (i32, i32) {
    %c0_i32 = arith.constant 0 : i32
    %c0_i32_0 = arith.constant 0 : i32
    %c0_i32_1 = arith.constant 0 : i32
    return %c0_i32, %c0_i32_0 : i32, i32
  }
  func.func @transform_7(%arg0: i32) -> (i32, i32) {
    %c0_i32 = arith.constant 0 : i32
    %c0_i32_0 = arith.constant 0 : i32
    %c0_i32_1 = arith.constant 0 : i32
    return %c0_i32, %c0_i32_0 : i32, i32
  }
  func.func @transform_8(%arg0: i32) -> (i32, i32) {
    %c0_i32 = arith.constant 0 : i32
    %c0_i32_0 = arith.constant 0 : i32
    %c0_i32_1 = arith.constant 0 : i32
    return %c0_i32, %c0_i32_0 : i32, i32
  }
  func.func @transform_9(%arg0: i32) -> (i32, i32) {
    %c0_i32 = arith.constant 0 : i32
    %c0_i32_0 = arith.constant 0 : i32
    %c0_i32_1 = arith.constant 0 : i32
    return %c0_i32, %c0_i32_0 : i32, i32
  }
  func.func @transform_10(%arg0: i32) -> (i32, i32) {
    %c0_i32 = arith.constant 0 : i32
    %c0_i32_0 = arith.constant 0 : i32
    %c0_i32_1 = arith.constant 0 : i32
    return %c0_i32, %c0_i32_0 : i32, i32
  }
  func.func @transform_11(%arg0: i32) -> (i32, i32) {
    %c0_i32 = arith.constant 0 : i32
    %c0_i32_0 = arith.constant 0 : i32
    %c0_i32_1 = arith.constant 0 : i32
    return %c0_i32, %c0_i32_0 : i32, i32
  }
  func.func @transform_12(%arg0: i32) -> (i32, i32, i32) {
    %c0_i32 = arith.constant 0 : i32
    %c0_i32_0 = arith.constant 0 : i32
    %c0_i32_1 = arith.constant 0 : i32
    return %arg0, %c0_i32, %c0_i32_0 : i32, i32, i32
  }
}

</mosaic_0001>

<bundles_post_ra>
// kernel: tpu_custom_call.1
= control target key start
LH: loop header
LB: loop body
LE: loop exit
PB: predicated region body
PF: predicated region fallthrough
CT: control target
= control target key end

     0   :  { %17 = vsyncpa [#allocation3], 0  ;;  %s3645_s0 = inlined_call_operand.hbm [shape: bf16[2,8,128], index: 0, kind: input, shape index: {}]   ;;  %s3646_s1 = inlined_call_operand.hbm [shape: bf16[2,8,128], index: 1, kind: input, shape index: {}]   ;;  %s3647_s2 = inlined_call_operand.hbm [shape: bf16[128,384], index: 2, kind: input, shape index: {}]   ;;  %s3648_s3 = inlined_call_operand.hbm [shape: bf16[128,128], index: 3, kind: input, shape index: {}]   ;;  %s3649_s4 = inlined_call_operand.hbm [shape: bf16[128,256], index: 4, kind: input, shape index: {}]   ;;  %s3650_s5 = inlined_call_operand.hbm [shape: bf16[256,128], index: 5, kind: input, shape index: {}]   ;;  %s3651_s6 = inlined_call_operand.hbm [shape: bf16[128,128], index: 6, kind: input, shape index: {}]   ;;  %s3652_s7 = inlined_call_operand.hbm [shape: bf16[128,384], index: 7, kind: input, shape index: {}]   ;;  %s3653_s8 = inlined_call_operand.hbm [shape: bf16[128,128], index: 8, kind: input, shape index: {}]   ;;  %s3654_s9 = inlined_call_operand.hbm [shape: bf16[128,256], index: 9, kind: input, shape index: {}]   ;;  %s3655_s10 = inlined_call_operand.hbm [shape: bf16[256,128], index: 10, kind: input, shape index: {}]   ;;  %s3656_s11 = inlined_call_operand.hbm [shape: bf16[128,128], index: 11, kind: input, shape index: {}]   ;;  %s3657_s12 = inlined_call_operand.hbm [shape: f32[2,8,128], index: 12, kind: output, shape index: {}]  }
   0x1   :  { %18 = vsyncpa [#allocation6], 0 }
   0x2   :  { %19 = vsyncpa [#allocation9], 0 }
   0x3   :  { %20 = vsyncpa [#allocation12], 0 }
   0x4   :  { %21 = vsyncpa [#allocation15], 0 }
   0x5   :  { %22 = vsyncpa [#allocation18], 0 }
   0x6   :  { %23 = vsyncpa [#allocation21], 0 }
   0x7   :  { %24 = vsyncpa [#allocation4], 0  ;;  %s3322_s21 = smov [#allocation5]   ;;  %s3323_s23 = smov [#allocation8]  }
   0x8   :  { %s42_s22 = sshll.u32 %s3322_s21, 4  ;;  %s66_s24 = sshll.u32 %s3323_s23, 4  ;;  %s43_s22 = int_to_ptr.vmem [resolvable:$true] %s42_s22  ;;  %s67_s24 = int_to_ptr.vmem [resolvable:$true] %s66_s24 }
   0x9   :  { %s3054_s25 = scalar_lea.vmem %s43_s22, 128  ;;  %p3059_p1 = scmp.lt.s32.totalorder %s43_s22, %s43_s22 }
   0xa   :  { %p3055_p0 = scmp.ne.s32.totalorder %s43_s22, %s3054_s25  ;;  %p3060_p2 = scmp.lt.s32.totalorder %s3054_s25, %s3054_s25 }
   0xc   :  { %p3061_p3 = por %p3060_p2, %p3059_p1 }
   0xe   :  { %p3062_p4 = pnand %p3061_p3, %p3055_p0 }
  0x10   :  { %3065 = shalt.err (!%p3062_p4)
}
  0x11   :  { %s3324_s26 = smov 64   ;;  %s3325_s27 = smov 4  }
  0x12   :  { %48 = dma.hbm_to_vmem [thread:$0]  %s3646_s1, 128, %s43_s22, [#allocation6], %s3324_s26, %s3324_s26, %s3325_s27  }
  0x13   :  { %s3074_s30 = scalar_lea.vmem %s67_s24, 1024  ;;  %p3079_p6 = scmp.lt.s32.totalorder %s67_s24, %s67_s24 }
  0x14   :  { %p3075_p5 = scmp.ne.s32.totalorder %s67_s24, %s3074_s30  ;;  %p3080_p7 = scmp.lt.s32.totalorder %s3074_s30, %s3074_s30 }
  0x16   :  { %p3081_p8 = por %p3080_p7, %p3079_p6 }
  0x18   :  { %p3082_p9 = pnand %p3081_p8, %p3075_p5 }
  0x1a   :  { %3085 = shalt.err (!%p3082_p9)
}
  0x1b   :  { %72 = dma.hbm_to_vmem [thread:$0]  %s3648_s3, 1024, %s67_s24, [#allocation9], %s3324_s26, %s3324_s26, %s3325_s27  }
  0x1c   :  { %s3326_s15 = smov [#allocation11]  }
  0x1d   :  { %s90_s16 = sshll.u32 %s3326_s15, 4  ;;  %s91_s16 = int_to_ptr.vmem [resolvable:$true] %s90_s16 }
  0x1e   :  { %s3094_s17 = scalar_lea.vmem %s91_s16, 2048  ;;  %p3099_p11 = scmp.lt.s32.totalorder %s91_s16, %s91_s16 }
  0x1f   :  { %p3095_p10 = scmp.ne.s32.totalorder %s91_s16, %s3094_s17  ;;  %p3100_p12 = scmp.lt.s32.totalorder %s3094_s17, %s3094_s17 }
  0x21   :  { %p3101_p13 = por %p3100_p12, %p3099_p11 }
  0x23   :  { %p3102_p0 = pnand %p3101_p13, %p3095_p10 }
  0x25   :  { %3105 = shalt.err (!%p3102_p0)
}
  0x26   :  { %96 = dma.hbm_to_vmem [thread:$0]  %s3650_s5, 2048, %s91_s16, [#allocation12], %s3324_s26, %s3324_s26, %s3325_s27  }
  0x27   :  { %s3327_s19 = smov [#allocation14]  }
  0x28   :  { %s114_s20 = sshll.u32 %s3327_s19, 4  ;;  %s115_s20 = int_to_ptr.vmem [resolvable:$true] %s114_s20 }
  0x29   :  { %s3114_s3 = scalar_lea.vmem %s115_s20, 3072  ;;  %p3119_p2 = scmp.lt.s32.totalorder %s115_s20, %s115_s20 }
  0x2a   :  { %p3115_p1 = scmp.ne.s32.totalorder %s115_s20, %s3114_s3  ;;  %p3120_p3 = scmp.lt.s32.totalorder %s3114_s3, %s3114_s3 }
  0x2c   :  { %p3121_p4 = por %p3120_p3, %p3119_p2 }
  0x2e   :  { %p3122_p5 = pnand %p3121_p4, %p3115_p1 }
  0x30   :  { %3125 = shalt.err (!%p3122_p5)
}
  0x31   :  { %s3328_s21 = smov 192   ;;  %s3329_s22 = smov 12  }
  0x32   :  { %120 = dma.hbm_to_vmem [thread:$0]  %s3652_s7, 3072, %s115_s20, [#allocation15], %s3328_s21, %s3328_s21, %s3329_s22  }
  0x33   :  { %s3330_s5 = smov [#allocation17]   ;;  %s3331_s28 = smov [#allocation2]  }
  0x34   :  { %s138_s25 = sshll.u32 %s3330_s5, 4  ;;  %s30_s29 = sshll.u32 %s3331_s28, 4  ;;  %s139_s25 = int_to_ptr.vmem [resolvable:$true] %s138_s25  ;;  %s31_s29 = int_to_ptr.vmem [resolvable:$true] %s30_s29 }
  0x35   :  { %s3134_s30 = scalar_lea.vmem %s139_s25, 2048  ;;  %p3139_p7 = scmp.lt.s32.totalorder %s139_s25, %s139_s25 }
  0x36   :  { %p3135_p6 = scmp.ne.s32.totalorder %s139_s25, %s3134_s30  ;;  %p3140_p8 = scmp.lt.s32.totalorder %s3134_s30, %s3134_s30 }
  0x38   :  { %p3141_p9 = por %p3140_p8, %p3139_p7 }
  0x3a   :  { %p3142_p10 = pnand %p3141_p9, %p3135_p6 }
  0x3c   :  { %3145 = shalt.err (!%p3142_p10)
}
  0x3d   :  { %s3332_s13 = smov 128   ;;  %s3333_s14 = smov 8  }
  0x3e   :  { %144 = dma.hbm_to_vmem [thread:$0]  %s3654_s9, 2048, %s139_s25, [#allocation18], %s3332_s13, %s3332_s13, %s3333_s14  }
  0x3f   :  { %s3154_s16 = scalar_lea.vmem %s31_s29, 128  ;;  %p3159_p12 = scmp.lt.s32.totalorder %s31_s29, %s31_s29 }
  0x40   :  { %p3155_p11 = scmp.ne.s32.totalorder %s31_s29, %s3154_s16  ;;  %p3160_p13 = scmp.lt.s32.totalorder %s3154_s16, %s3154_s16 }
  0x42   :  { %p3161_p0 = por %p3160_p13, %p3159_p12 }
  0x44   :  { %p3162_p1 = pnand %p3161_p0, %p3155_p11 }
  0x46   :  { %3165 = shalt.err (!%p3162_p1)
}
  0x47   :  { %36 = dma.hbm_to_vmem [thread:$0]  %s3645_s0, 128, %s31_s29, [#allocation3], %s3324_s26, %s3324_s26, %s3325_s27  }
  0x48   :  { %s3334_s18 = smov [#allocation7]   ;;  %s3335_s20 = smov [#allocation10]  }
  0x49   :  { %s54_s19 = sshll.u32 %s3334_s18, 4  ;;  %s78_s3 = sshll.u32 %s3335_s20, 4  ;;  %s55_s19 = int_to_ptr.vmem [resolvable:$true] %s54_s19  ;;  %s79_s3 = int_to_ptr.vmem [resolvable:$true] %s78_s3 }
  0x4a   :  { %s3174_s9 = scalar_lea.vmem %s55_s19, 3072  ;;  %p3179_p3 = scmp.lt.s32.totalorder %s55_s19, %s55_s19 }
  0x4b   :  { %p3175_p2 = scmp.ne.s32.totalorder %s55_s19, %s3174_s9  ;;  %p3180_p4 = scmp.lt.s32.totalorder %s3174_s9, %s3174_s9 }
  0x4d   :  { %p3181_p5 = por %p3180_p4, %p3179_p3 }
  0x4f   :  { %p3182_p6 = pnand %p3181_p5, %p3175_p2 }
  0x51   :  { %3185 = shalt.err (!%p3182_p6)
}
  0x52   :  { %60 = dma.hbm_to_vmem [thread:$0]  %s3647_s2, 3072, %s55_s19, [#allocation6], %s3328_s21, %s3328_s21, %s3329_s22  }
  0x53   :  { %s3194_s0 = scalar_lea.vmem %s79_s3, 2048  ;;  %p3199_p8 = scmp.lt.s32.totalorder %s79_s3, %s79_s3 }
  0x54   :  { %p3195_p7 = scmp.ne.s32.totalorder %s79_s3, %s3194_s0  ;;  %p3200_p9 = scmp.lt.s32.totalorder %s3194_s0, %s3194_s0 }
  0x56   :  { %p3201_p10 = por %p3200_p9, %p3199_p8 }
  0x58   :  { %p3202_p11 = pnand %p3201_p10, %p3195_p7 }
  0x5a   :  { %3205 = shalt.err (!%p3202_p11)
}
  0x5b   :  { %84 = dma.hbm_to_vmem [thread:$0]  %s3649_s4, 2048, %s79_s3, [#allocation9], %s3332_s13, %s3332_s13, %s3333_s14  }
  0x5c   :  { %s3336_s28 = smov [#allocation13]   ;;  %s3337_s30 = smov [#allocation16]  }
  0x5d   :  { %s102_s29 = sshll.u32 %s3336_s28, 4  ;;  %s126_s15 = sshll.u32 %s3337_s30, 4  ;;  %s103_s29 = int_to_ptr.vmem [resolvable:$true] %s102_s29  ;;  %s127_s15 = int_to_ptr.vmem [resolvable:$true] %s126_s15 }
  0x5e   :  { %s3214_s2 = scalar_lea.vmem %s103_s29, 1024  ;;  %p3219_p13 = scmp.lt.s32.totalorder %s103_s29, %s103_s29 }
  0x5f   :  { %p3215_p12 = scmp.ne.s32.totalorder %s103_s29, %s3214_s2  ;;  %p3220_p0 = scmp.lt.s32.totalorder %s3214_s2, %s3214_s2 }
  0x61   :  { %p3221_p1 = por %p3220_p0, %p3219_p13 }
  0x63   :  { %p3222_p2 = pnand %p3221_p1, %p3215_p12 }
  0x65   :  { %3225 = shalt.err (!%p3222_p2)
}
  0x66   :  { %108 = dma.hbm_to_vmem [thread:$0]  %s3651_s6, 1024, %s103_s29, [#allocation12], %s3324_s26, %s3324_s26, %s3325_s27  }
  0x67   :  { %s3234_s4 = scalar_lea.vmem %s127_s15, 1024  ;;  %p3239_p4 = scmp.lt.s32.totalorder %s127_s15, %s127_s15 }
  0x68   :  { %p3235_p3 = scmp.ne.s32.totalorder %s127_s15, %s3234_s4  ;;  %p3240_p5 = scmp.lt.s32.totalorder %s3234_s4, %s3234_s4 }
  0x6a   :  { %p3241_p6 = por %p3240_p5, %p3239_p4 }
  0x6c   :  { %p3242_p7 = pnand %p3241_p6, %p3235_p3 }
  0x6e   :  { %3245 = shalt.err (!%p3242_p7)
}
  0x6f   :  { %132 = dma.hbm_to_vmem [thread:$0]  %s3653_s8, 1024, %s127_s15, [#allocation15], %s3324_s26, %s3324_s26, %s3325_s27  }
  0x70   :  { %s3338_s17 = smov [#allocation19]   ;;  %s3339_s18 = smov [#allocation20]  }
  0x71   :  { %s150_s1 = sshll.u32 %s3338_s17, 4  ;;  %s162_s19 = sshll.u32 %s3339_s18, 4  ;;  %s151_s1 = int_to_ptr.vmem [resolvable:$true] %s150_s1  ;;  %s163_s19 = int_to_ptr.vmem [resolvable:$true] %s162_s19 }
  0x72   :  { %s3254_s6 = scalar_lea.vmem %s151_s1, 2048  ;;  %p3259_p9 = scmp.lt.s32.totalorder %s151_s1, %s151_s1 }
  0x73   :  { %p3255_p8 = scmp.ne.s32.totalorder %s151_s1, %s3254_s6  ;;  %p3260_p10 = scmp.lt.s32.totalorder %s3254_s6, %s3254_s6 }
  0x75   :  { %p3261_p11 = por %p3260_p10, %p3259_p9 }
  0x77   :  { %p3262_p12 = pnand %p3261_p11, %p3255_p8 }
  0x79   :  { %3265 = shalt.err (!%p3262_p12)
}
  0x7a   :  { %156 = dma.hbm_to_vmem [thread:$0]  %s3655_s10, 2048, %s151_s1, [#allocation18], %s3324_s26, %s3324_s26, %s3325_s27  }
  0x7b   :  { %s3274_s8 = scalar_lea.vmem %s163_s19, 1024  ;;  %p3279_p0 = scmp.lt.s32.totalorder %s163_s19, %s163_s19 }
  0x7c   :  { %p3275_p13 = scmp.ne.s32.totalorder %s163_s19, %s3274_s8  ;;  %p3280_p1 = scmp.lt.s32.totalorder %s3274_s8, %s3274_s8 }
  0x7e   :  { %p3281_p2 = por %p3280_p1, %p3279_p0 }
  0x80   :  { %p3282_p3 = pnand %p3281_p2, %p3275_p13 }
  0x82   :  { %3285 = shalt.err (!%p3282_p3)
}
  0x83   :  { %168 = dma.hbm_to_vmem [thread:$0]  %s3656_s11, 1024, %s163_s19, [#allocation21], %s3324_s26, %s3324_s26, %s3325_s27  }
  0x84   :  { %3306 = dma.done.wait [#allocation3], 128  }
  0x85   :  { %3307 = vsyncadd [#allocation3], 4294967168 }
  0x86   :  { %3308 = dma.done.wait [#allocation6], 3200  }
  0x87   :  { %3309 = vsyncadd [#allocation6], 4294964096 }
  0x88   :  { %3310 = dma.done.wait [#allocation9], 3072  }
  0x89   :  { %3311 = vsyncadd [#allocation9], 4294964224 }
  0x8a   :  { %3312 = dma.done.wait [#allocation12], 3072  }
  0x8b   :  { %3313 = vsyncadd [#allocation12], 4294964224 }
  0x8c   :  { %3314 = dma.done.wait [#allocation15], 4096  }
  0x8d   :  { %3315 = vsyncadd [#allocation15], 4294963200 }
  0x8e   :  { %3316 = dma.done.wait [#allocation18], 4096  }
  0x8f   :  { %3317 = vsyncadd [#allocation18], 4294963200 }
  0x90   :  { %3318 = dma.done.wait [#allocation21], 1024  }
  0x91   :  { %3319 = vsyncadd [#allocation21], 4294966272  ;;  %v3340_v0 = vmov 0   ;;  %v3341_v1 = vmov 0.0   ;;  %vm3342_vm0 = vmmov 0   ;;  %v3488_v23 = vld [vmem:[#allocation2] sm:$0xff]  }
  0x92   :  { %472 = vmatprep.mubr.bf16.mxu0 %v3340_v0  ;;  %2628 = vmatprep.subr.bf16.mxu1 %v3341_v1  ;;  %v2818_v2 = vld [vmem:[#allocation7 + $0xac] ss:$12 sps:$4 sm:$0xff]   ;;  %v2820_v3 = vld [vmem:[#allocation7 + $0xa8] ss:$12 sps:$4 sm:$0xff]   ;;  %v2823_v5 = vld [vmem:[#allocation7 + $0x90] ss:$12 sps:$4 sm:$0xff]  }
  0x93   :  { %2644 = vmatprep.mubr.msk.bf16.mxu1 %vm3342_vm0, %v3341_v1  ;;  %440 = vmatprep.subr.bf16.mxu0 %v2818_v2  ;;  %v2821_v4 = vld [vmem:[#allocation7 + $0x94] ss:$12 sps:$4 sm:$0xff]   ;;  %v2824_v6 = vld [vmem:[#allocation7 + $0x7c] ss:$12 sps:$4 sm:$0xff]   ;;  %v2826_v7 = vld [vmem:[#allocation7 + $0x78] ss:$12 sps:$4 sm:$0xff]  }
  0x94   :  { %441 = vmatpush1.bf16.msra.mxu0 %v2820_v3  ;;  %v2827_v8 = vld [vmem:[#allocation7 + $0x64] ss:$12 sps:$4 sm:$0xff]   ;;  %v2829_v9 = vld [vmem:[#allocation7 + $0x60] ss:$12 sps:$4 sm:$0xff]   ;;  %v2832_v13 = vld [vmem:[#allocation7 + $0x48] ss:$12 sps:$4 sm:$0xff]  }
  0x95   :  { %442 = vmatprep.subr.bf16.mxu0 %v2821_v4  ;;  %v2843_v10 = vld [vmem:[#allocation7 + $0xb0] ss:$12 sps:$4 sm:$0xff]   ;;  %v2830_v11 = vld [vmem:[#allocation7 + $0x4c] ss:$12 sps:$4 sm:$0xff]   ;;  %v2833_v14 = vld [vmem:[#allocation7 + $0x34] ss:$12 sps:$4 sm:$0xff]  }
  0x96   :  { %2629 = vmatpush3.bf16.msra.mxu1 %v2843_v10  ;;  %v2844_v12 = vld [vmem:[#allocation7 + $0x98] ss:$12 sps:$4 sm:$0xff]   ;;  %v2835_v15 = vld [vmem:[#allocation7 + $0x30] ss:$12 sps:$4 sm:$0xff]   ;;  %v2845_v16 = vld [vmem:[#allocation7 + $0x80] ss:$12 sps:$4 sm:$0xff]  }
  0x97   :  { %2630 = vmatprep.subr.bf16.mxu1 %v3341_v1  ;;  %v2836_v17 = vld [vmem:[#allocation7 + $0x1c] ss:$12 sps:$4 sm:$0xff]   ;;  %v2838_v19 = vld [vmem:[#allocation7 + $0x18] ss:$12 sps:$4 sm:$0xff]   ;;  %v2841_v22 = vld [vmem:[#allocation7] ss:$12 sps:$4 sm:$0xff]  }
  0x98   :  { %443 = vmatpush1.bf16.msra.mxu0 %v2823_v5  ;;  %v2846_v18 = vld [vmem:[#allocation7 + $0x68] ss:$12 sps:$4 sm:$0xff]   ;;  %v2839_v20 = vld [vmem:[#allocation7 + $0x4] ss:$12 sps:$4 sm:$0xff]   ;;  %v2849_v25 = vld [vmem:[#allocation7 + $0x20] ss:$12 sps:$4 sm:$0xff]  }
  0x99   :  { %444 = vmatprep.subr.bf16.mxu0 %v2824_v6  ;;  %v2847_v21 = vld [vmem:[#allocation7 + $0x50] ss:$12 sps:$4 sm:$0xff]   ;;  %v2848_v24 = vld [vmem:[#allocation7 + $0x38] ss:$12 sps:$4 sm:$0xff]   ;;  %v2850_v26 = vld [vmem:[#allocation7 + $0x8] ss:$12 sps:$4 sm:$0xff]  }
  0x9a   :  { %2631 = vmatpush3.bf16.msra.mxu1 %v2844_v12  ;;  %vm640_vm1 = vcmask 1043456   ;;  %vm610_vm2 = vcmask 64512   ;;  %v2851_v63 = vld [vmem:[#allocation8 + $0x38] sm:$0xff]   ;;  %v2852_v2 = vld [vmem:[#allocation8 + $0x30] sm:$0xff]   ;;  %v2853_v3 = vld [vmem:[#allocation8 + $0x28] sm:$0xff]   ;;  %s3343_s10 = smov [#allocation22]  }
  0x9b   :  { %2632 = vmatprep.subr.bf16.mxu1 %v3341_v1  ;;  %v2854_v4 = vld [vmem:[#allocation8 + $0x20] sm:$0xff]   ;;  %v2855_v5 = vld [vmem:[#allocation8 + $0x18] sm:$0xff]   ;;  %s2346_s11 = sshll.u32 %s3343_s10, 4  ;;  %s2347_s11 = int_to_ptr.vmem [resolvable:$true] %s2346_s11 }
  0x9c   :  { %445 = vmatpush1.bf16.msra.mxu0 %v2826_v7  ;;  %s3286_s26 = scalar_lea.vmem %s2347_s11, 256  ;;  %p3291_p5 = scmp.lt.s32.totalorder %s2347_s11, %s2347_s11 }
  0x9d   :  { %446 = vmatprep.subr.bf16.mxu0 %v2827_v8  ;;  %p3287_p4 = scmp.ne.s32.totalorder %s2347_s11, %s3286_s26  ;;  %p3292_p6 = scmp.lt.s32.totalorder %s3286_s26, %s3286_s26 }
  0x9e   :  { %2633 = vmatpush3.bf16.msra.mxu1 %v2845_v16  ;;  %v2856_v16 = vld [vmem:[#allocation8 + $0x10] sm:$0xff]  }
  0x9f   :  { %2634 = vmatprep.subr.bf16.mxu1 %v3341_v1  ;;  %p3293_p7 = por %p3292_p6, %p3291_p5 }
  0xa0   :  { %447 = vmatpush1.bf16.msra.mxu0 %v2829_v9 }
  0xa1   :  { %448 = vmatprep.subr.bf16.mxu0 %v2830_v11  ;;  %p3294_p8 = pnand %p3293_p7, %p3287_p4 }
  0xa2   :  { %2635 = vmatpush3.bf16.msra.mxu1 %v2846_v18  ;;  %v2858_v18 = vld [vmem:[#allocation8] sm:$0xff]  }
  0xa3   :  { %2636 = vmatprep.subr.bf16.mxu1 %v3341_v1 }
  0xa4   :  { %449 = vmatpush1.bf16.msra.mxu0 %v2832_v13 }
  0xa5   :  { %450 = vmatprep.subr.bf16.mxu0 %v2833_v14 }
  0xa6   :  { %2637 = vmatpush3.bf16.msra.mxu1 %v2847_v21 }
  0xa7   :  { %2638 = vmatprep.subr.bf16.mxu1 %v3341_v1 }
  0xa8   :  { %451 = vmatpush1.bf16.msra.mxu0 %v2835_v15 }
  0xa9   :  { %452 = vmatprep.subr.bf16.mxu0 %v2836_v17  ;;  %v2857_v17 = vld [vmem:[#allocation8 + $0x8] sm:$0xff]  }
  0xaa   :  { %2639 = vmatpush3.bf16.msra.mxu1 %v2848_v24 }
  0xab   :  { %2640 = vmatprep.subr.bf16.mxu1 %v3341_v1 }
  0xac   :  { %453 = vmatpush1.bf16.msra.mxu0 %v2838_v19 }
  0xad   :  { %454 = vmatprep.subr.bf16.mxu0 %v2839_v20 }
  0xae   :  { %2641 = vmatpush3.bf16.msra.mxu1 %v2849_v25 }
  0xaf   :  { %2642 = vmatprep.subr.bf16.mxu1 %v3341_v1 }
  0xb0   :  { %455 = vmatpush1.bf16.msra.mxu0 %v2841_v22 }
  0xb1   :  { %2672 = vmatprep.subr.bf16.mxu0 %v3341_v1 }
  0xb2   :  { %2643 = vmatpush3.bf16.msra.mxu1 %v2850_v26 }
  0xb3   :  { %473 = vmatmul.mubr.bf16.vlgmr.msra.gmra.mxu0 %v3488_v23  ;;  %2648 = vmatprep.subr.bf16.mxu1 %v3341_v1 }
  0xb4   :  { %2688 = vmatprep.mubr.msk.bf16.mxu0 %vm3342_vm0, %v3341_v1  ;;  %2673 = vmatpush3.bf16.msra.mxu0 %v2851_v63 }
  0xb5   :  { %2645 = vmatmul.mubr.bf16.vlgmr.msra.gmra.mxu1 %v3488_v23  ;;  %2674 = vmatprep.subr.bf16.mxu0 %v3341_v1 }
  0xb6   :  { %2650 = vmatprep.mubr.msk.bf16.mxu1 %vm3342_vm0, %v3341_v1 }
  0xb8   :  { %2675 = vmatpush3.bf16.msra.mxu0 %v2852_v2 }
  0xb9   :  { %2676 = vmatprep.subr.bf16.mxu0 %v3341_v1 }
  0xbc   :  { %2677 = vmatpush3.bf16.msra.mxu0 %v2853_v3 }
  0xbd   :  { %2678 = vmatprep.subr.bf16.mxu0 %v3341_v1 }
  0xc0   :  { %2679 = vmatpush3.bf16.msra.mxu0 %v2854_v4 }
  0xc1   :  { %2680 = vmatprep.subr.bf16.mxu0 %v3341_v1 }
  0xc4   :  { %2681 = vmatpush3.bf16.msra.mxu0 %v2855_v5 }
  0xc5   :  { %2682 = vmatprep.subr.bf16.mxu0 %v3341_v1 }
  0xc8   :  { %2683 = vmatpush3.bf16.msra.mxu0 %v2856_v16  ;;  %v2892_v16 = vld [vmem:[#allocation14 + $0x60] ss:$12 sps:$4 sm:$0xff]  }
  0xc9   :  { %2684 = vmatprep.subr.bf16.mxu0 %v3341_v1 }
  0xcc   :  { %2685 = vmatpush3.bf16.msra.mxu0 %v2857_v17  ;;  %v2897_v17 = vld [vmem:[#allocation14 + $0x4c] ss:$12 sps:$4 sm:$0xff]  }
  0xcd   :  { %2686 = vmatprep.subr.bf16.mxu0 %v3341_v1 }
  0xd0   :  { %2687 = vmatpush3.bf16.msra.mxu0 %v2858_v18  ;;  %v2895_v18 = vld [vmem:[#allocation14 + $0x48] ss:$12 sps:$4 sm:$0xff]  }
 0x173   :  { %v474_v27 = vpop.f32.mrf.mxu0 }
 0x174   :  { %v524_v32 = vpack.c.bf16 %v474_v27, %v474_v27 }
 0x175   :  { %v476_v28 = vpop.f32.mrf.mxu0  ;;  %v517_v33 = vpop.f32.mrf.mxu1 }
 0x176   :  { %v526_v29 = vpack.c.bf16 %v476_v28, %v476_v28  ;;  %v635_v36 = vpack.c.bf16 %v517_v33, %v517_v33 }
 0x177   :  { %v478_v30 = vpop.f32.mrf.mxu0  ;;  %v2646_v35 = vpop.f32.mrf.mxu1 }
 0x178   :  { %2649 = vmatpush3.bf16.xpose.msra.mxu1 %v526_v29  ;;  %v525_v39 = vpack.c.bf16 %v478_v30, %v478_v30  ;;  %v642_v40 = vsel %vm640_vm1, %v635_v36, 0  ;;  %v304_v29 = vunpack.c.l.bf16 %v3488_v23 }
 0x179   :  { %2654 = vmatprep.subr.bf16.mxu1 %v3341_v1  ;;  %v480_v31 = vpop.f32.mrf.mxu0  ;;  %v3505_v37 = vpop.f32.mrf.mxu1 }
 0x17a   :  { %v527_v34 = vpack.c.bf16 %v480_v31, %v480_v31  ;;  %v636_v9 = vpack.c.bf16 %v3505_v37, %v3505_v37  ;;  %v2859_v37 = vld [vmem:[#allocation10 + $0x70] ss:$8 sps:$4 sm:$0xff]  }
 0x17b   :  { %v2647_v38 = vpop.f32.mrf.mxu1 }
 0x17c   :  { %v688_v12 = vsel %vm640_vm1, %v636_v9, 0  ;;  %v2861_v38 = vld [vmem:[#allocation10 + $0x74] ss:$8 sps:$4 sm:$0xff]  }
 0x17d   :  { %v2883_v9 = vld [vmem:[#allocation14 + $0xa8] ss:$12 sps:$4 sm:$0xff]  }
 0x17f   :  { %2651 = vmatmul.mubr.bf16.vlgmr.msra.gmra.mxu1 %v524_v32  ;;  %v305_v32 = vunpack.c.h.bf16 %v3488_v23 }
 0x180   :  { %2655 = vmatpush3.bf16.xpose.msra.mxu1 %v527_v34  ;;  %2656 = vmatprep.mubr.msk.bf16.mxu1 %vm3342_vm0, %v3341_v1 }
 0x181   :  { %2660 = vmatprep.subr.bf16.mxu1 %v3341_v1 }
 0x187   :  { %2657 = vmatmul.mubr.bf16.vlgmr.msra.gmra.mxu1 %v525_v39  ;;  %v2864_v39 = vld [vmem:[#allocation10 + $0x64] ss:$8 sps:$4 sm:$0xff]  }
 0x188   :  { %2661 = vmatpush3.bf16.msra.mxu1 %v642_v40  ;;  %2662 = vmatprep.mubr.msk.bf16.mxu1 %vm3342_vm0, %v3341_v1  ;;  %v2862_v40 = vld [vmem:[#allocation10 + $0x60] ss:$8 sps:$4 sm:$0xff]  }
 0x189   :  { %2666 = vmatprep.subr.bf16.mxu1 %v3341_v1 }
 0x23f   :  { %v562_v41 = vpop.f32.mrf.mxu1 }
 0x240   :  { %v608_v42 = vmul.f32 0.088388346, %v562_v41 }
 0x241   :  { %v2652_v43 = vpop.f32.mrf.mxu1 }
 0x242   :  { %v611_v44 = vsel %vm610_vm2, %v608_v42, -inf }
 0x243   :  { %612 = vmax.xlane.f32.xlu0 %v611_v44  ;;  %v565_v45 = vpop.f32.mrf.mxu1 }
 0x245   :  { %v2653_v46 = vpop.f32.mrf.mxu1 }
 0x247   :  { %v602_v47 = vpop.f32.mrf.mxu1 }
 0x248   :  { %v609_v48 = vmul.f32 0.088388346, %v602_v47 }
 0x249   :  { %v2658_v49 = vpop.f32.mrf.mxu1 }
 0x24a   :  { %v614_v50 = vsel %vm610_vm2, %v609_v48, -inf  ;;  %v2865_v49 = vld [vmem:[#allocation10 + $0x50] ss:$8 sps:$4 sm:$0xff]  }
 0x24b   :  { %615 = vmax.xlane.f32.xlu0 %v614_v50  ;;  %v605_v51 = vpop.f32.mrf.mxu1  ;;  %v2870_v50 = vld [vmem:[#allocation10 + $0x44] ss:$8 sps:$4 sm:$0xff]  }
 0x24c   :  { %v2868_v51 = vld [vmem:[#allocation10 + $0x40] ss:$8 sps:$4 sm:$0xff]  }
 0x24d   :  { %v2659_v52 = vpop.f32.mrf.mxu1 }
 0x24e   :  { %v2871_v52 = vld [vmem:[#allocation10 + $0x30] ss:$8 sps:$4 sm:$0xff]  }
 0x2cc   :  { %v613_v53 = vpop.xlane.xlu0 %612 }
 0x2cd   :  { %v617_v54 = vsub.f32 %v608_v42, %v613_v53  ;;  %v2873_v53 = vld [vmem:[#allocation10 + $0x34] ss:$8 sps:$4 sm:$0xff]  }
 0x2cf   :  { %v619_v55 = vmul.f32 1.442695, %v617_v54  ;;  %v2876_v54 = vld [vmem:[#allocation10 + $0x24] ss:$8 sps:$4 sm:$0xff]  }
 0x2d1   :  { %2998 = vpow2.f32 %v619_v55  ;;  %v2874_v55 = vld [vmem:[#allocation10 + $0x20] ss:$8 sps:$4 sm:$0xff]  }
 0x2d4   :  { %v616_v56 = vpop.xlane.xlu0 %615 }
 0x2d5   :  { %v618_v57 = vsub.f32 %v609_v48, %v616_v56  ;;  %v2867_v48 = vld [vmem:[#allocation10 + $0x54] ss:$8 sps:$4 sm:$0xff]  }
 0x2d6   :  { %v2879_v56 = vld [vmem:[#allocation10 + $0x14] ss:$8 sps:$4 sm:$0xff]  }
 0x2d7   :  { %v621_v58 = vmul.f32 1.442695, %v618_v57  ;;  %v2877_v57 = vld [vmem:[#allocation10 + $0x10] ss:$8 sps:$4 sm:$0xff]  }
 0x2d9   :  { %3000 = vpow2.f32 %v621_v58  ;;  %v2882_v58 = vld [vmem:[#allocation10 + $0x4] ss:$8 sps:$4 sm:$0xff]  }
 0x2de   :  { %v2999_v59 = vpop.eup %2998 }
 0x2df   :  { %v623_v60 = vsel %vm610_vm2, %v2999_v59, 0.0 }
 0x2e0   :  { %624 = vadd.xlane.f32.xlu1 %v623_v60  ;;  %v2885_v60 = vld [vmem:[#allocation14 + $0xac] ss:$12 sps:$4 sm:$0xff]  }
 0x2e6   :  { %v3001_v61 = vpop.eup %3000 }
 0x2e7   :  { %v626_v62 = vsel %vm610_vm2, %v3001_v61, 0.0 }
 0x2e8   :  { %627 = vadd.xlane.f32.xlu1 %v626_v62 }
 0x369   :  { %v625_v6 = vpop.xlane.xlu1 %624 }
 0x36a   :  { %3002 = vrcp.f32 %v625_v6 }
 0x371   :  { %v628_v7 = vpop.xlane.xlu1 %627 }
 0x372   :  { %3004 = vrcp.f32 %v628_v7 }
 0x377   :  { %v3003_v8 = vpop.eup %3002 }
 0x378   :  { %v631_v10 = vmul.f32 %v3003_v8, %v2999_v59  ;;  %v2880_v59 = vld [vmem:[#allocation10] ss:$8 sps:$4 sm:$0xff]  }
 0x37a   :  { %v633_v11 = vpack.c.bf16 %v631_v10, %v631_v10 }
 0x37c   :  { %2663 = vmatmul.mubr.msk.bf16.vlgmr.msra.gmra.mxu1 %vm610_vm2, %v633_v11  ;;  %v2888_v11 = vld [vmem:[#allocation14 + $0x94] ss:$12 sps:$4 sm:$0xff]  }
 0x37d   :  { %2667 = vmatpush3.bf16.msra.mxu1 %v688_v12  ;;  %2668 = vmatprep.mubr.msk.bf16.mxu1 %vm3342_vm0, %v3341_v1  ;;  %v2886_v12 = vld [vmem:[#allocation14 + $0x90] ss:$12 sps:$4 sm:$0xff]  }
 0x37e   :  { %926 = vmatprep.subr.bf16.mxu1 %v2861_v38  ;;  %v2919_v38 = vld [vmem:[#allocation11 + $0x10] sm:$0xff]  }
 0x37f   :  { %v3005_v13 = vpop.eup %3004 }
 0x380   :  { %v632_v14 = vmul.f32 %v3005_v13, %v3001_v61  ;;  %v2891_v13 = vld [vmem:[#allocation14 + $0x7c] ss:$12 sps:$4 sm:$0xff]  }
 0x382   :  { %v634_v15 = vpack.c.bf16 %v632_v14, %v632_v14  ;;  %v2889_v14 = vld [vmem:[#allocation14 + $0x78] ss:$12 sps:$4 sm:$0xff]  }
 0x384   :  { %2669 = vmatmul.mubr.msk.bf16.vlgmr.msra.gmra.mxu1 %vm610_vm2, %v634_v15  ;;  %v2894_v15 = vld [vmem:[#allocation14 + $0x64] ss:$12 sps:$4 sm:$0xff]  }
 0x385   :  { %958 = vmatprep.mubr.bf16.mxu1 %v3340_v0  ;;  %927 = vmatpush1.bf16.msra.mxu1 %v2859_v37  ;;  %v2918_v37 = vld [vmem:[#allocation11 + $0x50] sm:$0xff]  }
 0x386   :  { %928 = vmatprep.subr.bf16.mxu1 %v2864_v39  ;;  %v2920_v39 = vld [vmem:[#allocation11 + $0x48] sm:$0xff]  }
 0x389   :  { %929 = vmatpush1.bf16.msra.mxu1 %v2862_v40  ;;  %v2921_v40 = vld [vmem:[#allocation11 + $0x8] sm:$0xff]  }
 0x38a   :  { %930 = vmatprep.subr.bf16.mxu1 %v2867_v48 }
 0x38d   :  { %931 = vmatpush1.bf16.msra.mxu1 %v2865_v49 }
 0x38e   :  { %932 = vmatprep.subr.bf16.mxu1 %v2870_v50 }
 0x391   :  { %933 = vmatpush1.bf16.msra.mxu1 %v2868_v51 }
 0x392   :  { %934 = vmatprep.subr.bf16.mxu1 %v2873_v53 }
 0x395   :  { %935 = vmatpush1.bf16.msra.mxu1 %v2871_v52 }
 0x396   :  { %936 = vmatprep.subr.bf16.mxu1 %v2876_v54 }
 0x399   :  { %937 = vmatpush1.bf16.msra.mxu1 %v2874_v55 }
 0x39a   :  { %938 = vmatprep.subr.bf16.mxu1 %v2879_v56 }
 0x39d   :  { %939 = vmatpush1.bf16.msra.mxu1 %v2877_v57 }
 0x39e   :  { %940 = vmatprep.subr.bf16.mxu1 %v2882_v58 }
 0x3a1   :  { %941 = vmatpush1.bf16.msra.mxu1 %v2880_v59 }
 0x3a2   :  { %1402 = vmatprep.subr.bf16.mxu1 %v2885_v60 }
 0x43c   :  { %v678_v19 = vpop.f32.mrf.mxu1 }
 0x43e   :  { %v2664_v20 = vpop.f32.mrf.mxu1 }
 0x43f   :  { %v2898_v20 = vld [vmem:[#allocation14 + $0x30] ss:$12 sps:$4 sm:$0xff]  }
 0x440   :  { %v681_v21 = vpop.f32.mrf.mxu1 }
 0x441   :  { %v2903_v21 = vld [vmem:[#allocation14 + $0x1c] ss:$12 sps:$4 sm:$0xff]  }
 0x442   :  { %v2665_v22 = vpop.f32.mrf.mxu1 }
 0x443   :  { %v2901_v22 = vld [vmem:[#allocation14 + $0x18] ss:$12 sps:$4 sm:$0xff]  }
 0x444   :  { %v724_v24 = vpop.f32.mrf.mxu1 }
 0x445   :  { %v730_v25 = vpack.c.bf16 %v724_v24, %v678_v19  ;;  %v2900_v19 = vld [vmem:[#allocation14 + $0x34] ss:$12 sps:$4 sm:$0xff]   ;;  %v2906_v24 = vld [vmem:[#allocation14 + $0x4] ss:$12 sps:$4 sm:$0xff]  }
 0x446   :  { %v2670_v26 = vpop.f32.mrf.mxu1 }
 0x447   :  { %2689 = vmatmul.mubr.bf16.vlgmr.msra.gmra.mxu0 %v730_v25  ;;  %v2904_v25 = vld [vmem:[#allocation14] ss:$12 sps:$4 sm:$0xff]   ;;  %v3540_v26 = vld [vmem:[#allocation5] sm:$0xff]  }
 0x448   :  { %v727_v27 = vpop.f32.mrf.mxu1 }
 0x449   :  { %v2908_v27 = vld [vmem:[#allocation11 + $0x78] sm:$0xff]  }
 0x44a   :  { %v2671_v28 = vpop.f32.mrf.mxu1  ;;  %2540 = vmatprep.subr.bf16.mxu0 %v2908_v27 }
 0x44b   :  { %v2909_v28 = vld [vmem:[#allocation11 + $0x38] sm:$0xff]  }
 0x44c   :  { %2541 = vmatpush3.bf16.msra.mxu0 %v2909_v28 }
 0x507   :  { %v813_v30 = vpop.f32.mrf.mxu0 }
 0x508   :  { %v820_v31 = vadd.f32 %v813_v30, %v304_v29  ;;  %v2910_v29 = vld [vmem:[#allocation11 + $0x70] sm:$0xff]  }
 0x509   :  { %v2690_v33 = vpop.f32.mrf.mxu0  ;;  %v2911_v30 = vld [vmem:[#allocation11 + $0x30] sm:$0xff]   ;;  %2542 = vmatprep.subr.bf16.mxu0 %v2910_v29 }
 0x50a   :  { %822 = vadd.xlane.f32.xlu0 %v820_v31  ;;  %2543 = vmatpush3.bf16.msra.mxu0 %v2911_v30  ;;  %v2914_v33 = vld [vmem:[#allocation11 + $0x60] sm:$0xff]  }
 0x50b   :  { %v816_v34 = vpop.f32.mrf.mxu0 }
 0x50c   :  { %v821_v35 = vadd.f32 %v816_v34, %v305_v32  ;;  %v2913_v32 = vld [vmem:[#allocation11 + $0x28] sm:$0xff]   ;;  %v2915_v34 = vld [vmem:[#allocation11 + $0x20] sm:$0xff]  }
 0x50d   :  { %v2691_v36 = vpop.f32.mrf.mxu0 }
 0x50e   :  { %824 = vadd.xlane.f32.xlu1 %v821_v35  ;;  %v2917_v36 = vld [vmem:[#allocation11 + $0x18] sm:$0xff]  }
 0x593   :  { %v823_v41 = vpop.xlane.xlu0 %822 }
 0x594   :  { %v827_v42 = vmul.f32 0.0078125, %v823_v41  ;;  %v2922_v41 = vld [vmem:[#allocation11 + $0x40] sm:$0xff]  }
 0x596   :  { %v829_v43 = vsub.f32 %v820_v31, %v827_v42  ;;  %v2912_v31 = vld [vmem:[#allocation11 + $0x68] sm:$0xff]   ;;  %v2923_v42 = vld [vmem:[#allocation11] sm:$0xff]  }
 0x597   :  { %v825_v44 = vpop.xlane.xlu1 %824  ;;  %2544 = vmatprep.subr.bf16.mxu0 %v2912_v31 }
 0x598   :  { %v828_v45 = vmul.f32 0.0078125, %v825_v44  ;;  %v831_v23 = vmul.f32 %v829_v43, %v829_v43  ;;  %2545 = vmatpush3.bf16.msra.mxu0 %v2913_v32 }
 0x599   :  { %2546 = vmatprep.subr.bf16.mxu0 %v2914_v33 }
 0x59a   :  { %v830_v46 = vsub.f32 %v821_v35, %v828_v45  ;;  %833 = vadd.xlane.f32.xlu0 %v831_v23  ;;  %v2916_v35 = vld [vmem:[#allocation11 + $0x58] sm:$0xff]  }
 0x59c   :  { %v832_v47 = vmul.f32 %v830_v46, %v830_v46  ;;  %2547 = vmatpush3.bf16.msra.mxu0 %v2915_v34  ;;  %v2924_v34 = vld [vmem:[#allocation14 + $0xb0] ss:$12 sps:$4 sm:$0xff]  }
 0x59d   :  { %2548 = vmatprep.subr.bf16.mxu0 %v2916_v35  ;;  %v2925_v35 = vld [vmem:[#allocation14 + $0x98] ss:$12 sps:$4 sm:$0xff]  }
 0x59e   :  { %835 = vadd.xlane.f32.xlu1 %v832_v47 }
 0x5a0   :  { %2549 = vmatpush3.bf16.msra.mxu0 %v2917_v36  ;;  %v2926_v36 = vld [vmem:[#allocation14 + $0x80] ss:$12 sps:$4 sm:$0xff]  }
 0x5a1   :  { %2550 = vmatprep.subr.bf16.mxu0 %v2918_v37  ;;  %v2927_v37 = vld [vmem:[#allocation14 + $0x68] ss:$12 sps:$4 sm:$0xff]  }
 0x5a4   :  { %2551 = vmatpush3.bf16.msra.mxu0 %v2919_v38  ;;  %v2928_v38 = vld [vmem:[#allocation14 + $0x50] ss:$12 sps:$4 sm:$0xff]  }
 0x5a5   :  { %2552 = vmatprep.subr.bf16.mxu0 %v2920_v39  ;;  %v2929_v39 = vld [vmem:[#allocation14 + $0x38] ss:$12 sps:$4 sm:$0xff]  }
 0x5a8   :  { %2553 = vmatpush3.bf16.msra.mxu0 %v2921_v40  ;;  %v2930_v40 = vld [vmem:[#allocation14 + $0x20] ss:$12 sps:$4 sm:$0xff]  }
 0x5a9   :  { %2554 = vmatprep.subr.bf16.mxu0 %v2922_v41  ;;  %v2931_v41 = vld [vmem:[#allocation14 + $0x8] ss:$12 sps:$4 sm:$0xff]  }
 0x5ac   :  { %2555 = vmatpush3.bf16.msra.mxu0 %v2923_v42 }
 0x5ad   :  { %2692 = vmatprep.subr.bf16.mxu0 %v3341_v1 }
 0x623   :  { %v834_v61 = vpop.xlane.xlu0 %833 }
 0x624   :  { %v837_v62 = vmul.f32 0.0078125, %v834_v61 }
 0x626   :  { %v839_v63 = vadd.f32 1e-12, %v837_v62 }
 0x627   :  { %v836_v2 = vpop.xlane.xlu1 %835 }
 0x628   :  { %v838_v3 = vmul.f32 0.0078125, %v836_v2  ;;  %3006 = vrsqrt.f32 %v839_v63 }
 0x62a   :  { %v840_v4 = vadd.f32 1e-12, %v838_v3 }
 0x62c   :  { %3008 = vrsqrt.f32 %v840_v4 }
 0x635   :  { %v3007_v5 = vpop.eup %3006 }
 0x636   :  { %v3533_v7 = vmul.f32 %v3007_v5, %v829_v43 }
 0x639   :  { %v3009_v6 = vpop.eup %3008 }
 0x63a   :  { %v3535_v8 = vmul.f32 %v3009_v6, %v830_v46 }
 0x63c   :  { %v845_v10 = vpack.c.bf16 %v3535_v8, %v3533_v7 }
 0x63e   :  { %959 = vmatmul.mubr.bf16.vlgmr.msra.gmra.mxu1 %v845_v10 }
 0x63f   :  { %1403 = vmatpush1.bf16.msra.mxu1 %v2883_v9  ;;  %1434 = vmatprep.mubr.bf16.mxu1 %v3340_v0 }
 0x640   :  { %1404 = vmatprep.subr.bf16.mxu1 %v2888_v11 }
 0x643   :  { %1405 = vmatpush1.bf16.msra.mxu1 %v2886_v12 }
 0x644   :  { %1406 = vmatprep.subr.bf16.mxu1 %v2891_v13 }
 0x647   :  { %1407 = vmatpush1.bf16.msra.mxu1 %v2889_v14 }
 0x648   :  { %1408 = vmatprep.subr.bf16.mxu1 %v2894_v15 }
 0x64b   :  { %1409 = vmatpush1.bf16.msra.mxu1 %v2892_v16 }
 0x64c   :  { %1410 = vmatprep.subr.bf16.mxu1 %v2897_v17 }
 0x64f   :  { %1411 = vmatpush1.bf16.msra.mxu1 %v2895_v18 }
 0x650   :  { %1412 = vmatprep.subr.bf16.mxu1 %v2900_v19 }
 0x653   :  { %1413 = vmatpush1.bf16.msra.mxu1 %v2898_v20 }
 0x654   :  { %1414 = vmatprep.subr.bf16.mxu1 %v2903_v21 }
 0x657   :  { %1415 = vmatpush1.bf16.msra.mxu1 %v2901_v22 }
 0x658   :  { %1416 = vmatprep.subr.bf16.mxu1 %v2906_v24 }
 0x65b   :  { %1417 = vmatpush1.bf16.msra.mxu1 %v2904_v25 }
 0x65c   :  { %2712 = vmatprep.subr.bf16.mxu1 %v3341_v1 }
 0x65e   :  { %1435 = vmatmul.mubr.bf16.vlgmr.msra.gmra.mxu1 %v3540_v26 }
 0x65f   :  { %2714 = vmatprep.mubr.msk.bf16.mxu1 %vm3342_vm0, %v3341_v1 }
 0x6fe   :  { %v960_v43 = vpop.f32.mrf.mxu1 }
 0x6ff   :  { %v973_v44 = vmul.f32 0.044715, %v960_v43  ;;  %v969_v17 = vmul.f32 0.5, %v960_v43 }
 0x700   :  { %v962_v45 = vpop.f32.mrf.mxu1 }
 0x701   :  { %v977_v23 = vmul.f32 %v973_v44, %v960_v43  ;;  %v974_v46 = vmul.f32 0.044715, %v962_v45  ;;  %v970_v14 = vmul.f32 0.5, %v962_v45 }
 0x702   :  { %v964_v47 = vpop.f32.mrf.mxu1 }
 0x703   :  { %v981_v48 = vmul.f32 %v977_v23, %v960_v43  ;;  %v978_v49 = vmul.f32 %v974_v46, %v962_v45  ;;  %v975_v50 = vmul.f32 0.044715, %v964_v47  ;;  %v971_v12 = vmul.f32 0.5, %v964_v47 }
 0x704   :  { %v966_v51 = vpop.f32.mrf.mxu1 }
 0x705   :  { %v985_v52 = vadd.f32 %v981_v48, %v960_v43  ;;  %v982_v53 = vmul.f32 %v978_v49, %v962_v45  ;;  %v979_v54 = vmul.f32 %v975_v50, %v964_v47  ;;  %v976_v55 = vmul.f32 0.044715, %v966_v51 }
 0x706   :  { %v972_v15 = vmul.f32 0.5, %v966_v51 }
 0x707   :  { %v986_v56 = vadd.f32 %v982_v53, %v962_v45  ;;  %v983_v57 = vmul.f32 %v979_v54, %v964_v47  ;;  %v980_v58 = vmul.f32 %v976_v55, %v966_v51  ;;  %v989_v59 = vmul.f32 0.7978846, %v985_v52 }
 0x709   :  { %v990_v60 = vmul.f32 0.7978846, %v986_v56  ;;  %v987_v61 = vadd.f32 %v983_v57, %v964_v47  ;;  %v984_v62 = vmul.f32 %v980_v58, %v966_v51 }
 0x70b   :  { %3010 = vtanh.f32 %v990_v60  ;;  %v991_v63 = vmul.f32 0.7978846, %v987_v61  ;;  %v988_v2 = vadd.f32 %v984_v62, %v966_v51 }
 0x70c   :  { %3012 = vtanh.f32 %v989_v59 }
 0x70d   :  { %3014 = vtanh.f32 %v991_v63  ;;  %v992_v3 = vmul.f32 0.7978846, %v988_v2 }
 0x70f   :  { %3016 = vtanh.f32 %v992_v3 }
 0x718   :  { %v3011_v4 = vpop.eup %3010 }
 0x719   :  { %v3013_v5 = vpop.eup %3012  ;;  %v998_v9 = vadd.f32 1.0, %v3011_v4 }
 0x71a   :  { %v3015_v6 = vpop.eup %3014  ;;  %v997_v13 = vadd.f32 1.0, %v3013_v5 }
 0x71b   :  { %v999_v10 = vadd.f32 1.0, %v3015_v6  ;;  %v1002_v20 = vmul.f32 %v998_v9, %v970_v14  ;;  %v2932_v14 = vld [vmem:[#allocation16 + $0x38] sm:$0xff]  }
 0x71c   :  { %v3017_v11 = vpop.eup %3016  ;;  %v1001_v24 = vmul.f32 %v997_v13, %v969_v17  ;;  %v2935_v17 = vld [vmem:[#allocation16 + $0x20] sm:$0xff]  }
 0x71d   :  { %v1000_v16 = vadd.f32 1.0, %v3017_v11  ;;  %v1003_v19 = vmul.f32 %v999_v10, %v971_v12 }
 0x71e   :  { %v1436_v18 = vpop.f32.mrf.mxu1 }
 0x71f   :  { %v1004_v21 = vmul.f32 %v1000_v16, %v972_v15  ;;  %v1005_v29 = vpack.c.bf16 %v1003_v19, %v1001_v24  ;;  %v1486_v31 = vpack.c.bf16 %v1436_v18, %v1436_v18  ;;  %v2933_v15 = vld [vmem:[#allocation16 + $0x30] sm:$0xff]   ;;  %v2934_v16 = vld [vmem:[#allocation16 + $0x28] sm:$0xff]   ;;  %v2936_v18 = vld [vmem:[#allocation16 + $0x18] sm:$0xff]  }
 0x720   :  { %v1438_v22 = vpop.f32.mrf.mxu1 }
 0x721   :  { %v1488_v25 = vpack.c.bf16 %v1438_v22, %v1438_v22  ;;  %v1006_v27 = vpack.c.bf16 %v1004_v21, %v1002_v20 }
 0x722   :  { %v1440_v28 = vpop.f32.mrf.mxu1 }
 0x723   :  { %2713 = vmatpush3.bf16.xpose.msra.mxu1 %v1488_v25  ;;  %1135 = vmatprep.mubr.bf16.mxu0 %v1006_v27  ;;  %v1487_v33 = vpack.c.bf16 %v1440_v28, %v1440_v28 }
 0x724   :  { %1136 = vmatmul.mubr.bf16.vlgmr.msra.gmra.mxu0 %v1005_v29  ;;  %2718 = vmatprep.subr.bf16.mxu1 %v3341_v1  ;;  %v1442_v30 = vpop.f32.mrf.mxu1 }
 0x725   :  { %2708 = vmatprep.mubr.msk.bf16.mxu0 %vm3342_vm0, %v3341_v1  ;;  %v1489_v32 = vpack.c.bf16 %v1442_v30, %v1442_v30  ;;  %2693 = vmatpush3.bf16.msra.mxu0 %v2924_v34 }
 0x726   :  { %2694 = vmatprep.subr.bf16.mxu0 %v3341_v1 }
 0x729   :  { %2695 = vmatpush3.bf16.msra.mxu0 %v2925_v35 }
 0x72a   :  { %2715 = vmatmul.mubr.bf16.vlgmr.msra.gmra.mxu1 %v1486_v31  ;;  %2696 = vmatprep.subr.bf16.mxu0 %v3341_v1  ;;  %v2937_v31 = vld [vmem:[#allocation16 + $0x10] sm:$0xff]  }
 0x72b   :  { %2719 = vmatpush3.bf16.xpose.msra.mxu1 %v1489_v32  ;;  %2720 = vmatprep.mubr.msk.bf16.mxu1 %vm3342_vm0, %v3341_v1  ;;  %v2938_v32 = vld [vmem:[#allocation16 + $0x8] sm:$0xff]  }
 0x72c   :  { %2724 = vmatprep.subr.bf16.mxu1 %v3341_v1 }
 0x72d   :  { %2697 = vmatpush3.bf16.msra.mxu0 %v2926_v36 }
 0x72e   :  { %2698 = vmatprep.subr.bf16.mxu0 %v3341_v1 }
 0x731   :  { %2699 = vmatpush3.bf16.msra.mxu0 %v2927_v37 }
 0x732   :  { %2721 = vmatmul.mubr.bf16.vlgmr.msra.gmra.mxu1 %v1487_v33  ;;  %2700 = vmatprep.subr.bf16.mxu0 %v3341_v1  ;;  %v2939_v33 = vld [vmem:[#allocation16] sm:$0xff]  }
 0x733   :  { %2726 = vmatprep.mubr.msk.bf16.mxu1 %vm3342_vm0, %v3341_v1 }
 0x735   :  { %2701 = vmatpush3.bf16.msra.mxu0 %v2928_v38 }
 0x736   :  { %2702 = vmatprep.subr.bf16.mxu0 %v3341_v1 }
 0x739   :  { %2703 = vmatpush3.bf16.msra.mxu0 %v2929_v39 }
 0x73a   :  { %2704 = vmatprep.subr.bf16.mxu0 %v3341_v1 }
 0x73d   :  { %2705 = vmatpush3.bf16.msra.mxu0 %v2930_v40 }
 0x73e   :  { %2706 = vmatprep.subr.bf16.mxu0 %v3341_v1 }
 0x741   :  { %2707 = vmatpush3.bf16.msra.mxu0 %v2931_v41 }
 0x742   :  { %2736 = vmatprep.subr.bf16.mxu0 %v3341_v1 }
 0x744   :  { %2709 = vmatmul.mubr.bf16.vlgmr.msra.gmra.mxu0 %v3540_v26 }
 0x745   :  { %2752 = vmatprep.mubr.msk.bf16.mxu0 %vm3342_vm0, %v3341_v1  ;;  %2737 = vmatpush3.bf16.msra.mxu0 %v2932_v14 }
 0x746   :  { %2738 = vmatprep.subr.bf16.mxu0 %v3341_v1 }
 0x749   :  { %2739 = vmatpush3.bf16.msra.mxu0 %v2933_v15 }
 0x74a   :  { %2740 = vmatprep.subr.bf16.mxu0 %v3341_v1 }
 0x74d   :  { %2741 = vmatpush3.bf16.msra.mxu0 %v2934_v16 }
 0x74e   :  { %2742 = vmatprep.subr.bf16.mxu0 %v3341_v1 }
 0x751   :  { %2743 = vmatpush3.bf16.msra.mxu0 %v2935_v17 }
 0x752   :  { %2744 = vmatprep.subr.bf16.mxu0 %v3341_v1 }
 0x755   :  { %2745 = vmatpush3.bf16.msra.mxu0 %v2936_v18 }
 0x756   :  { %2746 = vmatprep.subr.bf16.mxu0 %v3341_v1 }
 0x759   :  { %2747 = vmatpush3.bf16.msra.mxu0 %v2937_v31  ;;  %v2969_v31 = vld [vmem:[#allocation19 + $0x28] sm:$0xff]  }
 0x75a   :  { %2748 = vmatprep.subr.bf16.mxu0 %v3341_v1 }
 0x75d   :  { %2749 = vmatpush3.bf16.msra.mxu0 %v2938_v32  ;;  %v2970_v32 = vld [vmem:[#allocation19 + $0x60] sm:$0xff]  }
 0x75e   :  { %2750 = vmatprep.subr.bf16.mxu0 %v3341_v1 }
 0x761   :  { %2751 = vmatpush3.bf16.msra.mxu0 %v2939_v33  ;;  %v2971_v33 = vld [vmem:[#allocation19 + $0x20] sm:$0xff]  }
 0x7e4   :  { %v2556_v42 = vpop.f32.mrf.mxu0 }
 0x7e6   :  { %v2557_v43 = vpop.f32.mrf.mxu0 }
 0x7e7   :  { %v3566_v44 = vadd.f32 %v2557_v43, %v2556_v42  ;;  %v1266_v42 = vunpack.c.l.bf16 %v3540_v26 }
 0x7e8   :  { %v3571_v2 = vpop.f32.mrf.mxu0 }
 0x7ea   :  { %v1524_v45 = vpop.f32.mrf.mxu1  ;;  %v3574_v5 = vpop.f32.mrf.mxu0 }
 0x7eb   :  { %v1570_v23 = vmul.f32 0.088388346, %v1524_v45 }
 0x7ec   :  { %v2716_v46 = vpop.f32.mrf.mxu1 }
 0x7ed   :  { %v1572_v47 = vsel %vm610_vm2, %v1570_v23, -inf }
 0x7ee   :  { %1573 = vmax.xlane.f32.xlu0 %v1572_v47  ;;  %v1527_v48 = vpop.f32.mrf.mxu1 }
 0x7f0   :  { %v2717_v49 = vpop.f32.mrf.mxu1 }
 0x7f2   :  { %v1564_v50 = vpop.f32.mrf.mxu1 }
 0x7f3   :  { %v1571_v51 = vmul.f32 0.088388346, %v1564_v50  ;;  %v2940_v50 = vld [vmem:[#allocation17 + $0x70] ss:$8 sps:$4 sm:$0xff]  }
 0x7f4   :  { %v2722_v52 = vpop.f32.mrf.mxu1 }
 0x7f5   :  { %v1575_v53 = vsel %vm610_vm2, %v1571_v51, -inf  ;;  %v2945_v52 = vld [vmem:[#allocation17 + $0x64] ss:$8 sps:$4 sm:$0xff]  }
 0x7f6   :  { %1576 = vmax.xlane.f32.xlu1 %v1575_v53  ;;  %v1567_v54 = vpop.f32.mrf.mxu1  ;;  %v2943_v53 = vld [vmem:[#allocation17 + $0x60] ss:$8 sps:$4 sm:$0xff]  }
 0x7f8   :  { %v2723_v55 = vpop.f32.mrf.mxu1 }
 0x804   :  { %v1479_v6 = vpop.f32.mrf.mxu0 }
 0x805   :  { %v1596_v9 = vpack.c.bf16 %v1479_v6, %v1479_v6  ;;  %v2951_v6 = vld [vmem:[#allocation17 + $0x44] ss:$8 sps:$4 sm:$0xff]  }
 0x806   :  { %v2710_v10 = vpop.f32.mrf.mxu0 }
 0x807   :  { %v1602_v11 = vsel %vm640_vm1, %v1596_v9, 0  ;;  %v2949_v9 = vld [vmem:[#allocation17 + $0x40] ss:$8 sps:$4 sm:$0xff]   ;;  %v2960_v10 = vld [vmem:[#allocation17 + $0x14] ss:$8 sps:$4 sm:$0xff]  }
 0x808   :  { %v1482_v12 = vpop.f32.mrf.mxu0  ;;  %2725 = vmatpush3.bf16.msra.mxu1 %v1602_v11  ;;  %v2963_v11 = vld [vmem:[#allocation17 + $0x4] ss:$8 sps:$4 sm:$0xff]  }
 0x809   :  { %2730 = vmatprep.subr.bf16.mxu1 %v3341_v1  ;;  %v1597_v22 = vpack.c.bf16 %v1482_v12, %v1482_v12  ;;  %v2961_v12 = vld [vmem:[#allocation17] ss:$8 sps:$4 sm:$0xff]  }
 0x80a   :  { %v2711_v13 = vpop.f32.mrf.mxu0 }
 0x80b   :  { %v1648_v27 = vsel %vm640_vm1, %v1597_v22, 0 }
 0x877   :  { %v1574_v56 = vpop.xlane.xlu0 %1573 }
 0x878   :  { %v1578_v57 = vsub.f32 %v1570_v23, %v1574_v56  ;;  %v1267_v23 = vunpack.c.h.bf16 %v3540_v26 }
 0x87a   :  { %v1580_v58 = vmul.f32 1.442695, %v1578_v57 }
 0x87c   :  { %3018 = vpow2.f32 %v1580_v58 }
 0x87f   :  { %v1577_v59 = vpop.xlane.xlu1 %1576 }
 0x880   :  { %v1579_v60 = vsub.f32 %v1571_v51, %v1577_v59  ;;  %v2942_v51 = vld [vmem:[#allocation17 + $0x74] ss:$8 sps:$4 sm:$0xff]  }
 0x882   :  { %v1582_v61 = vmul.f32 1.442695, %v1579_v60  ;;  %v2561_v60 = vadd.f32 %v3574_v5, %v3571_v2  ;;  %v2954_v2 = vld [vmem:[#allocation17 + $0x34] ss:$8 sps:$4 sm:$0xff]   ;;  %v2952_v5 = vld [vmem:[#allocation17 + $0x30] ss:$8 sps:$4 sm:$0xff]  }
 0x884   :  { %3020 = vpow2.f32 %v1582_v61 }
 0x889   :  { %v3019_v62 = vpop.eup %3018 }
 0x88a   :  { %v1584_v63 = vsel %vm610_vm2, %v3019_v62, 0.0 }
 0x88b   :  { %1585 = vadd.xlane.f32.xlu0 %v1584_v63  ;;  %v3601_v63 = vadd.f32 %v2561_v60, %v3535_v8  ;;  %v2958_v8 = vld [vmem:[#allocation17 + $0x10] ss:$8 sps:$4 sm:$0xff]  }
 0x891   :  { %v3021_v3 = vpop.eup %3020 }
 0x892   :  { %v1587_v4 = vsel %vm610_vm2, %v3021_v3, 0.0 }
 0x893   :  { %1588 = vadd.xlane.f32.xlu1 %v1587_v4  ;;  %v2946_v4 = vld [vmem:[#allocation17 + $0x50] ss:$8 sps:$4 sm:$0xff]  }
 0x914   :  { %v1586_v19 = vpop.xlane.xlu0 %1585 }
 0x915   :  { %3022 = vrcp.f32 %v1586_v19 }
 0x91c   :  { %v1589_v20 = vpop.xlane.xlu1 %1588 }
 0x91d   :  { %3024 = vrcp.f32 %v1589_v20 }
 0x922   :  { %v3023_v21 = vpop.eup %3022 }
 0x923   :  { %v1592_v24 = vmul.f32 %v3023_v21, %v3019_v62  ;;  %v3597_v62 = vadd.f32 %v3566_v44, %v3533_v7  ;;  %v2957_v7 = vld [vmem:[#allocation17 + $0x24] ss:$8 sps:$4 sm:$0xff]   ;;  %v2955_v44 = vld [vmem:[#allocation17 + $0x20] ss:$8 sps:$4 sm:$0xff]  }
 0x925   :  { %v1594_v25 = vpack.c.bf16 %v1592_v24, %v1592_v24 }
 0x927   :  { %2727 = vmatmul.mubr.msk.bf16.vlgmr.msra.gmra.mxu1 %vm610_vm2, %v1594_v25  ;;  %v2964_v25 = vld [vmem:[#allocation19 + $0x78] sm:$0xff]  }
 0x928   :  { %2731 = vmatpush3.bf16.msra.mxu1 %v1648_v27  ;;  %2732 = vmatprep.mubr.msk.bf16.mxu1 %vm3342_vm0, %v3341_v1  ;;  %v2965_v27 = vld [vmem:[#allocation19 + $0x38] sm:$0xff]  }
 0x929   :  { %1885 = vmatprep.subr.bf16.mxu1 %v2942_v51  ;;  %2588 = vmatprep.subr.bf16.mxu0 %v2964_v25 }
 0x92a   :  { %v3025_v28 = vpop.eup %3024 }
 0x92b   :  { %v1593_v29 = vmul.f32 %v3025_v28, %v3021_v3  ;;  %v2948_v3 = vld [vmem:[#allocation17 + $0x54] ss:$8 sps:$4 sm:$0xff]  }
 0x92c   :  { %v2966_v28 = vld [vmem:[#allocation19 + $0x70] sm:$0xff]  }
 0x92d   :  { %v1595_v30 = vpack.c.bf16 %v1593_v29, %v1593_v29  ;;  %v2967_v29 = vld [vmem:[#allocation19 + $0x30] sm:$0xff]  }
 0x92f   :  { %2733 = vmatmul.mubr.msk.bf16.vlgmr.msra.gmra.mxu1 %vm610_vm2, %v1595_v30  ;;  %v2968_v30 = vld [vmem:[#allocation19 + $0x68] sm:$0xff]  }
 0x930   :  { %1917 = vmatprep.mubr.bf16.mxu1 %v3340_v0  ;;  %1886 = vmatpush1.bf16.msra.mxu1 %v2940_v50 }
 0x931   :  { %1887 = vmatprep.subr.bf16.mxu1 %v2945_v52 }
 0x934   :  { %1888 = vmatpush1.bf16.msra.mxu1 %v2943_v53 }
 0x935   :  { %1889 = vmatprep.subr.bf16.mxu1 %v2948_v3 }
 0x938   :  { %1890 = vmatpush1.bf16.msra.mxu1 %v2946_v4 }
 0x939   :  { %1891 = vmatprep.subr.bf16.mxu1 %v2951_v6 }
 0x93c   :  { %1892 = vmatpush1.bf16.msra.mxu1 %v2949_v9 }
 0x93d   :  { %1893 = vmatprep.subr.bf16.mxu1 %v2954_v2 }
 0x940   :  { %1894 = vmatpush1.bf16.msra.mxu1 %v2952_v5 }
 0x941   :  { %1895 = vmatprep.subr.bf16.mxu1 %v2957_v7 }
 0x944   :  { %1896 = vmatpush1.bf16.msra.mxu1 %v2955_v44 }
 0x945   :  { %1897 = vmatprep.subr.bf16.mxu1 %v2960_v10 }
 0x948   :  { %1898 = vmatpush1.bf16.msra.mxu1 %v2958_v8 }
 0x949   :  { %1899 = vmatprep.subr.bf16.mxu1 %v2963_v11 }
 0x94c   :  { %1900 = vmatpush1.bf16.msra.mxu1 %v2961_v12 }
 0x94d   :  { %2756 = vmatprep.subr.bf16.mxu1 %v3341_v1 }
 0x9e7   :  { %v1638_v34 = vpop.f32.mrf.mxu1 }
 0x9e9   :  { %v2728_v35 = vpop.f32.mrf.mxu1 }
 0x9ea   :  { %v2973_v35 = vld [vmem:[#allocation19 + $0x18] sm:$0xff]  }
 0x9eb   :  { %v1641_v36 = vpop.f32.mrf.mxu1 }
 0x9ec   :  { %v2974_v36 = vld [vmem:[#allocation19 + $0x50] sm:$0xff]  }
 0x9ed   :  { %v2729_v37 = vpop.f32.mrf.mxu1 }
 0x9ee   :  { %v2975_v37 = vld [vmem:[#allocation19 + $0x10] sm:$0xff]  }
 0x9ef   :  { %v1684_v38 = vpop.f32.mrf.mxu1 }
 0x9f0   :  { %v1690_v39 = vpack.c.bf16 %v1684_v38, %v1638_v34  ;;  %v2972_v34 = vld [vmem:[#allocation19 + $0x58] sm:$0xff]   ;;  %v2976_v38 = vld [vmem:[#allocation19 + $0x48] sm:$0xff]  }
 0x9f1   :  { %v2734_v40 = vpop.f32.mrf.mxu1 }
 0x9f2   :  { %2753 = vmatmul.mubr.bf16.vlgmr.msra.gmra.mxu0 %v1690_v39  ;;  %v2977_v39 = vld [vmem:[#allocation19 + $0x8] sm:$0xff]   ;;  %v2978_v40 = vld [vmem:[#allocation19 + $0x40] sm:$0xff]  }
 0x9f3   :  { %v1687_v41 = vpop.f32.mrf.mxu1  ;;  %2589 = vmatpush3.bf16.msra.mxu0 %v2965_v27 }
 0x9f4   :  { %2590 = vmatprep.subr.bf16.mxu0 %v2966_v28  ;;  %v2979_v41 = vld [vmem:[#allocation19] sm:$0xff]  }
 0x9f5   :  { %v2735_v0 = vpop.f32.mrf.mxu1 }
 0x9f7   :  { %2591 = vmatpush3.bf16.msra.mxu0 %v2967_v29 }
 0x9f8   :  { %2592 = vmatprep.subr.bf16.mxu0 %v2968_v30 }
 0x9fb   :  { %2593 = vmatpush3.bf16.msra.mxu0 %v2969_v31 }
 0x9fc   :  { %2594 = vmatprep.subr.bf16.mxu0 %v2970_v32 }
 0x9ff   :  { %2595 = vmatpush3.bf16.msra.mxu0 %v2971_v33 }
 0xa00   :  { %2596 = vmatprep.subr.bf16.mxu0 %v2972_v34 }
 0xa03   :  { %2597 = vmatpush3.bf16.msra.mxu0 %v2973_v35 }
 0xa04   :  { %2598 = vmatprep.subr.bf16.mxu0 %v2974_v36 }
 0xa07   :  { %2599 = vmatpush3.bf16.msra.mxu0 %v2975_v37 }
 0xa08   :  { %2600 = vmatprep.subr.bf16.mxu0 %v2976_v38 }
 0xa0b   :  { %2601 = vmatpush3.bf16.msra.mxu0 %v2977_v39 }
 0xa0c   :  { %2602 = vmatprep.subr.bf16.mxu0 %v2978_v40 }
 0xa0f   :  { %2603 = vmatpush3.bf16.msra.mxu0 %v2979_v41 }
 0xa10   :  { %2776 = vmatprep.subr.bf16.mxu0 %v3341_v1 }
 0xab2   :  { %v1773_v43 = vpop.f32.mrf.mxu0 }
 0xab3   :  { %v1780_v45 = vadd.f32 %v1773_v43, %v1266_v42 }
 0xab4   :  { %v2754_v46 = vpop.f32.mrf.mxu0 }
 0xab5   :  { %1782 = vadd.xlane.f32.xlu0 %v1780_v45 }
 0xab6   :  { %v1776_v47 = vpop.f32.mrf.mxu0 }
 0xab7   :  { %v1781_v48 = vadd.f32 %v1776_v47, %v1267_v23 }
 0xab8   :  { %v2755_v49 = vpop.f32.mrf.mxu0 }
 0xab9   :  { %1784 = vadd.xlane.f32.xlu1 %v1781_v48 }
 0xb3e   :  { %v1783_v54 = vpop.xlane.xlu0 %1782 }
 0xb3f   :  { %v1786_v55 = vmul.f32 0.0078125, %v1783_v54 }
 0xb41   :  { %v1788_v56 = vsub.f32 %v1780_v45, %v1786_v55 }
 0xb42   :  { %v1785_v57 = vpop.xlane.xlu1 %1784 }
 0xb43   :  { %v1787_v58 = vmul.f32 0.0078125, %v1785_v57  ;;  %v1790_v26 = vmul.f32 %v1788_v56, %v1788_v56 }
 0xb45   :  { %v1789_v59 = vsub.f32 %v1781_v48, %v1787_v58  ;;  %1792 = vadd.xlane.f32.xlu0 %v1790_v26 }
 0xb47   :  { %v1791_v61 = vmul.f32 %v1789_v59, %v1789_v59 }
 0xb49   :  { %1794 = vadd.xlane.f32.xlu1 %v1791_v61  ;;  %1146 = vadd.xlane.f32.xlu0 %v3597_v62 }
 0xb4d   :  { %1148 = vadd.xlane.f32.xlu1 %v3601_v63 }
 0xbce   :  { %v1793_v13 = vpop.xlane.xlu0 %1792 }
 0xbcf   :  { %v1796_v14 = vmul.f32 0.0078125, %v1793_v13 }
 0xbd1   :  { %v1798_v15 = vadd.f32 1e-12, %v1796_v14 }
 0xbd2   :  { %v1795_v16 = vpop.xlane.xlu1 %1794  ;;  %v1147_v25 = vpop.xlane.xlu0 %1146 }
 0xbd3   :  { %v1797_v17 = vmul.f32 0.0078125, %v1795_v16  ;;  %3026 = vrsqrt.f32 %v1798_v15  ;;  %v1150_v28 = vmul.f32 0.0078125, %v1147_v25 }
 0xbd5   :  { %v1799_v18 = vadd.f32 1e-12, %v1797_v17  ;;  %v3618_v33 = vsub.f32 %v3597_v62, %v1150_v28  ;;  %v2982_v62 = vld [vmem:[#allocation13 + $0x28] sm:$0xff]  }
 0xbd6   :  { %v1149_v29 = vpop.xlane.xlu1 %1148 }
 0xbd7   :  { %3028 = vrsqrt.f32 %v1799_v18  ;;  %v1151_v34 = vmul.f32 0.0078125, %v1149_v29  ;;  %v1154_v40 = vmul.f32 %v3618_v33, %v3618_v33 }
 0xbd9   :  { %v1153_v38 = vsub.f32 %v3601_v63, %v1151_v34  ;;  %v2984_v63 = vld [vmem:[#allocation13 + $0x18] sm:$0xff]  }
 0xbdb   :  { %v1155_v41 = vmul.f32 %v1153_v38, %v1153_v38 }
 0xbe0   :  { %v3027_v19 = vpop.eup %3026 }
 0xbe1   :  { %v3605_v21 = vmul.f32 %v3027_v19, %v1788_v56 }
 0xbe4   :  { %v3029_v20 = vpop.eup %3028 }
 0xbe5   :  { %v3607_v22 = vmul.f32 %v3029_v20, %v1789_v59 }
 0xbe7   :  { %v1804_v24 = vpack.c.bf16 %v3607_v22, %v3605_v21 }
 0xbe9   :  { %1918 = vmatmul.mubr.bf16.vlgmr.msra.gmra.mxu1 %v1804_v24  ;;  %v2980_v24 = vld [vmem:[#allocation13 + $0x38] sm:$0xff]  }
 0xbea   :  { %2772 = vmatprep.mubr.msk.bf16.mxu1 %vm3342_vm0, %v3341_v1 }
 0xca9   :  { %v1919_v0 = vpop.f32.mrf.mxu1 }
 0xcaa   :  { %v1932_v42 = vmul.f32 0.044715, %v1919_v0  ;;  %v1928_v14 = vmul.f32 0.5, %v1919_v0 }
 0xcab   :  { %v1921_v43 = vpop.f32.mrf.mxu1 }
 0xcac   :  { %v1936_v45 = vmul.f32 %v1932_v42, %v1919_v0  ;;  %v1933_v23 = vmul.f32 0.044715, %v1921_v43  ;;  %v1929_v11 = vmul.f32 0.5, %v1921_v43  ;;  %v2986_v42 = vld [vmem:[#allocation13 + $0x8] sm:$0xff]  }
 0xcad   :  { %v1923_v46 = vpop.f32.mrf.mxu1 }
 0xcae   :  { %v1940_v47 = vmul.f32 %v1936_v45, %v1919_v0  ;;  %v1937_v48 = vmul.f32 %v1933_v23, %v1921_v43  ;;  %v1934_v49 = vmul.f32 0.044715, %v1923_v46  ;;  %v1930_v10 = vmul.f32 0.5, %v1923_v46  ;;  %v2988_v45 = vld [vmem:[#allocation20 + $0x38] sm:$0xff]   ;;  %v2989_v23 = vld [vmem:[#allocation20 + $0x30] sm:$0xff]  }
 0xcaf   :  { %v1925_v50 = vpop.f32.mrf.mxu1  ;;  %2757 = vmatpush3.bf16.msra.mxu1 %v2988_v45 }
 0xcb0   :  { %v1944_v51 = vadd.f32 %v1940_v47, %v1919_v0  ;;  %v1941_v52 = vmul.f32 %v1937_v48, %v1921_v43  ;;  %v1938_v53 = vmul.f32 %v1934_v49, %v1923_v46  ;;  %v1935_v54 = vmul.f32 0.044715, %v1925_v50  ;;  %v2981_v0 = vld [vmem:[#allocation13 + $0x30] sm:$0xff]   ;;  %2758 = vmatprep.subr.bf16.mxu1 %v3341_v1 }
 0xcb1   :  { %v1931_v12 = vmul.f32 0.5, %v1925_v50 }
 0xcb2   :  { %v1945_v55 = vadd.f32 %v1941_v52, %v1921_v43  ;;  %v1942_v56 = vmul.f32 %v1938_v53, %v1923_v46  ;;  %v1939_v57 = vmul.f32 %v1935_v54, %v1925_v50  ;;  %v1948_v58 = vmul.f32 0.7978846, %v1944_v51  ;;  %v2987_v43 = vld [vmem:[#allocation13] sm:$0xff]  }
 0xcb3   :  { %2759 = vmatpush3.bf16.msra.mxu1 %v2989_v23 }
 0xcb4   :  { %v1949_v26 = vmul.f32 0.7978846, %v1945_v55  ;;  %v1946_v59 = vadd.f32 %v1942_v56, %v1923_v46  ;;  %v1943_v60 = vmul.f32 %v1939_v57, %v1925_v50  ;;  %2760 = vmatprep.subr.bf16.mxu1 %v3341_v1 }
 0xcb6   :  { %3030 = vtanh.f32 %v1949_v26  ;;  %v1950_v61 = vmul.f32 0.7978846, %v1946_v59  ;;  %v1947_v3 = vadd.f32 %v1943_v60, %v1925_v50  ;;  %v2990_v59 = vld [vmem:[#allocation20 + $0x28] sm:$0xff]   ;;  %v2991_v60 = vld [vmem:[#allocation20 + $0x20] sm:$0xff]  }
 0xcb7   :  { %3032 = vtanh.f32 %v1948_v58  ;;  %2761 = vmatpush3.bf16.msra.mxu1 %v2990_v59 }
 0xcb8   :  { %3034 = vtanh.f32 %v1950_v61  ;;  %v1951_v4 = vmul.f32 0.7978846, %v1947_v3  ;;  %2762 = vmatprep.subr.bf16.mxu1 %v3341_v1  ;;  %v2992_v3 = vld [vmem:[#allocation20 + $0x18] sm:$0xff]  }
 0xcba   :  { %3036 = vtanh.f32 %v1951_v4 }
 0xcbb   :  { %2763 = vmatpush3.bf16.msra.mxu1 %v2991_v60 }
 0xcbc   :  { %2764 = vmatprep.subr.bf16.mxu1 %v3341_v1 }
 0xcbf   :  { %2765 = vmatpush3.bf16.msra.mxu1 %v2992_v3 }
 0xcc0   :  { %2766 = vmatprep.subr.bf16.mxu1 %v3341_v1 }
 0xcc3   :  { %v3031_v6 = vpop.eup %3030 }
 0xcc4   :  { %v3033_v9 = vpop.eup %3032  ;;  %v1957_v5 = vadd.f32 1.0, %v3031_v6 }
 0xcc5   :  { %v3035_v2 = vpop.eup %3034  ;;  %v1956_v8 = vadd.f32 1.0, %v3033_v9 }
 0xcc6   :  { %v1958_v7 = vadd.f32 1.0, %v3035_v2  ;;  %v1961_v16 = vmul.f32 %v1957_v5, %v1929_v11  ;;  %v2993_v5 = vld [vmem:[#allocation20 + $0x10] sm:$0xff]  }
 0xcc7   :  { %v3037_v44 = vpop.eup %3036  ;;  %v1960_v18 = vmul.f32 %v1956_v8, %v1928_v14  ;;  %2767 = vmatpush3.bf16.msra.mxu1 %v2993_v5 }
 0xcc8   :  { %v1959_v13 = vadd.f32 1.0, %v3037_v44  ;;  %v1962_v15 = vmul.f32 %v1958_v7, %v1930_v10  ;;  %v2994_v7 = vld [vmem:[#allocation20 + $0x8] sm:$0xff]   ;;  %2768 = vmatprep.subr.bf16.mxu1 %v3341_v1  ;;  %v2995_v44 = vld [vmem:[#allocation20] sm:$0xff]  }
 0xcca   :  { %v1963_v17 = vmul.f32 %v1959_v13, %v1931_v12  ;;  %v1964_v20 = vpack.c.bf16 %v1962_v15, %v1960_v18 }
 0xccb   :  { %2769 = vmatpush3.bf16.msra.mxu1 %v2994_v7 }
 0xccc   :  { %v1965_v19 = vpack.c.bf16 %v1963_v17, %v1961_v16  ;;  %2770 = vmatprep.subr.bf16.mxu1 %v3341_v1 }
 0xcce   :  { %2094 = vmatprep.mubr.bf16.mxu0 %v1965_v19 }
 0xccf   :  { %2095 = vmatmul.mubr.bf16.vlgmr.msra.gmra.mxu0 %v1964_v20  ;;  %2771 = vmatpush3.bf16.msra.mxu1 %v2995_v44 }
 0xcd0   :  { %2792 = vmatprep.mubr.msk.bf16.mxu0 %vm3342_vm0, %v3341_v1  ;;  %2777 = vmatpush3.bf16.msra.mxu0 %v2980_v24 }
 0xcd1   :  { %2778 = vmatprep.subr.bf16.mxu0 %v3341_v1 }
 0xcd4   :  { %2779 = vmatpush3.bf16.msra.mxu0 %v2981_v0 }
 0xcd5   :  { %2780 = vmatprep.subr.bf16.mxu0 %v3341_v1 }
 0xcd8   :  { %2781 = vmatpush3.bf16.msra.mxu0 %v2982_v62 }
 0xcd9   :  { %2782 = vmatprep.subr.bf16.mxu0 %v3341_v1 }
 0xd8f   :  { %v2604_v27 = vpop.f32.mrf.mxu0 }
 0xd91   :  { %v2605_v30 = vpop.f32.mrf.mxu0 }
 0xd92   :  { %v2606_v31 = vadd.f32 %v2605_v30, %v2604_v27 }
 0xd93   :  { %v2607_v32 = vpop.f32.mrf.mxu0 }
 0xd94   :  { %v2103_v35 = vadd.f32 %v2606_v31, %v3605_v21  ;;  %v2983_v21 = vld [vmem:[#allocation13 + $0x20] sm:$0xff]  }
 0xd95   :  { %v2608_v36 = vpop.f32.mrf.mxu0  ;;  %2783 = vmatpush3.bf16.msra.mxu0 %v2983_v21 }
 0xd96   :  { %v2609_v37 = vadd.f32 %v2608_v36, %v2607_v32  ;;  %2105 = vadd.xlane.f32.xlu0 %v2103_v35  ;;  %2784 = vmatprep.subr.bf16.mxu0 %v3341_v1 }
 0xd98   :  { %v2104_v39 = vadd.f32 %v2609_v37, %v3607_v22  ;;  %v2985_v22 = vld [vmem:[#allocation13 + $0x10] sm:$0xff]  }
 0xd99   :  { %2785 = vmatpush3.bf16.msra.mxu0 %v2984_v63 }
 0xd9a   :  { %2107 = vadd.xlane.f32.xlu1 %v2104_v39  ;;  %1156 = vadd.xlane.f32.xlu0 %v1154_v40 }
 0xd9b   :  { %2786 = vmatprep.subr.bf16.mxu0 %v3341_v1 }
 0xd9d   :  { %2787 = vmatpush3.bf16.msra.mxu0 %v2985_v22 }
 0xd9e   :  { %1158 = vadd.xlane.f32.xlu1 %v1155_v41  ;;  %2788 = vmatprep.subr.bf16.mxu0 %v3341_v1 }
 0xda1   :  { %2789 = vmatpush3.bf16.msra.mxu0 %v2986_v42 }
 0xda2   :  { %2790 = vmatprep.subr.bf16.mxu0 %v3341_v1 }
 0xda5   :  { %2791 = vmatpush3.bf16.msra.mxu0 %v2987_v43 }
 0xe1f   :  { %v2106_v46 = vpop.xlane.xlu0 %2105 }
 0xe20   :  { %v2109_v47 = vmul.f32 0.0078125, %v2106_v46 }
 0xe22   :  { %v2111_v48 = vsub.f32 %v2103_v35, %v2109_v47 }
 0xe23   :  { %v2108_v49 = vpop.xlane.xlu1 %2107  ;;  %v1157_v50 = vpop.xlane.xlu0 %1156 }
 0xe24   :  { %v2110_v51 = vmul.f32 0.0078125, %v2108_v49  ;;  %v1160_v52 = vmul.f32 0.0078125, %v1157_v50  ;;  %v2113_v53 = vmul.f32 %v2111_v48, %v2111_v48 }
 0xe26   :  { %v2112_v54 = vsub.f32 %v2104_v39, %v2110_v51  ;;  %v1162_v55 = vadd.f32 1e-12, %v1160_v52  ;;  %2115 = vadd.xlane.f32.xlu0 %v2113_v53 }
 0xe27   :  { %v1159_v56 = vpop.xlane.xlu1 %1158 }
 0xe28   :  { %v1161_v57 = vmul.f32 0.0078125, %v1159_v56  ;;  %v2114_v58 = vmul.f32 %v2112_v54, %v2112_v54  ;;  %3038 = vrsqrt.f32 %v1162_v55 }
 0xe2a   :  { %v1163_v26 = vadd.f32 1e-12, %v1161_v57  ;;  %2117 = vadd.xlane.f32.xlu1 %v2114_v58 }
 0xe2c   :  { %3040 = vrsqrt.f32 %v1163_v26 }
 0xe35   :  { %v3039_v61 = vpop.eup %3038 }
 0xe36   :  { %v1166_v6 = vmul.f32 %v3039_v61, %v3618_v33 }
 0xe39   :  { %v3041_v4 = vpop.eup %3040 }
 0xe3a   :  { %v1167_v9 = vmul.f32 %v3041_v4, %v1153_v38 }
 0xe3c   :  { %v2127_v2 = vpack.c.bf16 %v1167_v9, %v1166_v6 }
 0xe3e   :  { %2793 = vmatmul.mubr.bf16.vlgmr.msra.gmra.mxu0 %v2127_v2 }
 0xeaf   :  { %v2116_v10 = vpop.xlane.xlu0 %2115 }
 0xeb0   :  { %v2119_v8 = vmul.f32 0.0078125, %v2116_v10 }
 0xeb2   :  { %v2121_v11 = vadd.f32 1e-12, %v2119_v8 }
 0xeb3   :  { %v2118_v12 = vpop.xlane.xlu1 %2117 }
 0xeb4   :  { %v2120_v13 = vmul.f32 0.0078125, %v2118_v12  ;;  %3042 = vrsqrt.f32 %v2121_v11 }
 0xeb6   :  { %v2122_v14 = vadd.f32 1e-12, %v2120_v13 }
 0xeb8   :  { %3044 = vrsqrt.f32 %v2122_v14 }
 0xec1   :  { %v3043_v15 = vpop.eup %3042 }
 0xec2   :  { %v2125_v17 = vmul.f32 %v3043_v15, %v2111_v48 }
 0xec5   :  { %v3045_v16 = vpop.eup %3044 }
 0xec6   :  { %v2126_v18 = vmul.f32 %v3045_v16, %v2112_v54 }
 0xec8   :  { %v2144_v19 = vpack.c.bf16 %v2126_v18, %v2125_v17 }
 0xeca   :  { %2773 = vmatmul.mubr.bf16.vlgmr.msra.gmra.mxu1 %v2144_v19 }
 0xefe   :  { %v2332_v20 = vpop.f32.mrf.mxu0 }
 0xf00   :  { %v2794_v24 = vpop.f32.mrf.mxu0 }
 0xf02   :  { %v2335_v25 = vpop.f32.mrf.mxu0 }
 0xf04   :  { %v2795_v27 = vpop.f32.mrf.mxu0 }
 0xf8a   :  { %v2243_v1 = vpop.f32.mrf.mxu1 }
 0xf8b   :  { %v2333_v28 = vadd.f32 %v2332_v20, %v2243_v1 }
 0xf8c   :  { %v2774_v29 = vpop.f32.mrf.mxu1 }
 0xf8d   :  { %2339 = vst [vmem:[#allocation22] sm:$0xff] %v2333_v28 }
 0xf8e   :  { %v2246_v30 = vpop.f32.mrf.mxu1 }
 0xf8f   :  { %v2336_v31 = vadd.f32 %v2335_v25, %v2246_v30 }
 0xf90   :  { %v2775_v32 = vpop.f32.mrf.mxu1 }
 0xf91   :  { %2340 = vst [vmem:[#allocation22 + $0x8] sm:$0xff] %v2336_v31 }
 0xf92   :  { %3297 = shalt.err (!%p3294_p8)
}
 0xf93   :  { %2352 = dma.vmem_to_hbm [thread:$0]  %s2347_s11, 256, %s3657_s12, [#allocation4], %s3332_s13, %s3332_s13, %s3333_s14  }
 0xf94   :  { %3320 = dma.done.wait [#allocation4], 256  }
 0xf95   :  { %3321 = vsyncadd [#allocation4], 4294967040 }
 0xf96   :  { %2356 = vsyncpa [#allocation3], 1 }
 0xf97   :  { %2357 = vsyncpa [#allocation6], 1 }
 0xf98   :  { %2358 = vsyncpa [#allocation9], 1 }
 0xf99   :  { %2359 = vsyncpa [#allocation12], 1 }
 0xf9a   :  { %2360 = vsyncpa [#allocation15], 1 }
 0xf9b   :  { %2361 = vsyncpa [#allocation18], 1 }
 0xf9c   :  { %2362 = vsyncpa [#allocation21], 1 }
 0xf9d   :  { %2363 = vsyncpa [#allocation4], 1 }

</bundles_post_ra>
